<compile_context>
chip_gen: v7x
topology: tpu7x:2x2x1
jax: 0.10.0
libtpu: 0.0.40
codegen_flags: <defaults>
</compile_context>

<pallas_src>
import functools
import math

import numpy as np
import jax
import jax.numpy as jnp
from jax import lax
from jax.experimental import pallas as pl
from jax.experimental.pallas import tpu as pltpu


# ----------------------------------------------------------------------------
# Kernel 1: per-point linearized voxel id (elementwise, mem-bound)
# ----------------------------------------------------------------------------
def _point_ids_kernel(pts_ref, pid_ref, *, xmin, ymin, zmin, vsx, vsy, vsz,
                      gx, gy, gz, inv):
    """pts_ref: (C, TP) f32 channel-major points, pid_ref: (1, TP) i32."""
    x = pts_ref[0:1, :]
    y = pts_ref[1:2, :]
    z = pts_ref[2:3, :]
    # Keep the plain f32 division (voxel sizes are typically powers of two;
    # matches the NumPy/PyTorch reference computation bit-for-bit).
    cx = jnp.floor((x - xmin) / vsx).astype(jnp.int32)
    cy = jnp.floor((y - ymin) / vsy).astype(jnp.int32)
    cz = jnp.floor((z - zmin) / vsz).astype(jnp.int32)
    valid = ((cx >= 0) & (cy >= 0) & (cz >= 0)
             & (cx < gx) & (cy < gy) & (cz < gz))
    lin = (cx * gy + cy) * gz + cz               # ascending == lexicographic
    pid_ref[...] = jnp.where(valid, lin, inv)


# ----------------------------------------------------------------------------
# Kernel 2: per-block one-hot gather of sorted points into the output slab
# ----------------------------------------------------------------------------
def _gather_kernel(lo_ref, hi_ref, src_ref, pts_ref, vox_ref, *, C, PC, TJ):
    """One grid step fills TJ = V*M output columns (V voxels, M slots each).

    lo_ref/hi_ref: (n_blocks,) i32 SMEM  point-chunk range for this step
    src_ref:       (1, TJ) i32          sorted-point index feeding each column
    pts_ref:       (n_chunks, C, PC) f32 sorted points, chunk-major (resident)
    vox_ref:       (C, TJ) f32          lane-dense output block
    """
    i = pl.program_id(0)
    lo = lo_ref[i]
    hi = hi_ref[i]
    src = src_ref[...]                                      # (1, TJ) i32
    col = lax.broadcasted_iota(jnp.int32, (PC, 1), 0)       # point index in chunk

    def body(l, acc):
        p0 = l * PC
        # one-hot routing matrix: onehot[p, j] = 1 iff src[j] == p0 + p
        onehot = (src == (col + p0)).astype(jnp.bfloat16)   # (PC, TJ)

        x = pts_ref[l]                                      # (C, PC) f32
        # exact 3-piece f32 -> bf16 split (each output column receives exactly
        # one nonzero term, so the f32 re-accumulation is bit-exact for normal
        # floats; bf16-subnormal pieces could be flushed by the MXU).
        h0 = x.astype(jnp.bfloat16)
        r1 = x - h0.astype(jnp.float32)
        h1 = r1.astype(jnp.bfloat16)
        h2 = (r1 - h1.astype(jnp.float32)).astype(jnp.bfloat16)
        hp = jnp.concatenate([h0, h1, h2], axis=0)          # (3C, PC) bf16

        g = jnp.dot(hp, onehot, preferred_element_type=jnp.float32)  # (3C, TJ)
        return acc + (g[0:C, :] + g[C:2 * C, :] + g[2 * C:3 * C, :])

    acc = lax.fori_loop(lo, hi, body, jnp.zeros((C, TJ), jnp.float32))
    vox_ref[...] = acc


# ----------------------------------------------------------------------------
# Wrapper
# ----------------------------------------------------------------------------
def voxelize(points, voxel_size, point_cloud_range, max_num_points):
    """JAX/Pallas equivalent of Voxelization.forward.

    Returns (voxels_points (N, M, C) f32, voxels_coords (N, 3) i32,
    num_points_per_voxel (N,) i32), N = number of non-empty voxels.
    """
    points = jnp.asarray(points, jnp.float32)
    P, C = points.shape
    vs = np.asarray(voxel_size, np.float32)
    rng = np.asarray(point_cloud_range, np.float32)
    grid_size = np.round((rng[3:] - rng[:3]) / vs).astype(np.int32)
    gx, gy, gz = int(grid_size[0]), int(grid_size[1]), int(grid_size[2])
    n_cells = gx * gy * gz            # NOTE: int32 ids; huge grids would overflow
    INV = n_cells                     # sentinel id, larger than any valid id
    M = int(max_num_points)

    # ---- static tiling choices ----------------------------------------------
    PC = 128                                   # point chunk (MXU K dim)
    V0 = 128 // math.gcd(M, 128)               # smallest V with V*M % 128 == 0
    V = V0 * max(1, 64 // V0)                  # ~64 voxels per grid step
    TJ = V * M                                 # output columns per grid step

    P_pad = ((P + 1 + PC - 1) // PC) * PC      # >= 1 guaranteed zero pad point
    n_chunks_tot = P_pad // PC
    N_max = min(P, n_cells) + 1                # +1 leaves room for the INV entry
    N_pad = ((N_max + V - 1) // V) * V
    n_blocks = N_pad // V

    if P_pad <= 32768:
        TP = P_pad                             # whole row in one step
    else:
        TP = 128
        for cand in (32768, 16384, 8192, 4096, 2048, 1024, 512, 256):
            if P_pad % cand == 0:
                TP = cand
                break

    pad_val = float(rng[:3].min()) - 1.0e4     # out-of-range -> id == INV

    try:
        vmem_cap = int(pltpu.get_tpu_info().vmem_capacity_bytes)
    except Exception:
        vmem_cap = 64 * 1024 * 1024            # conservative (v7x) fallback
    vmem_limit = int(max(32 * 1024 * 1024,
                         min(vmem_cap - 16 * 1024 * 1024, 96 * 1024 * 1024)))

    k1 = functools.partial(
        _point_ids_kernel,
        xmin=float(rng[0]), ymin=float(rng[1]), zmin=float(rng[2]),
        vsx=float(vs[0]), vsy=float(vs[1]), vsz=float(vs[2]),
        gx=gx, gy=gy, gz=gz, inv=INV)
    k2 = functools.partial(_gather_kernel, C=C, PC=PC, TJ=TJ)

    @jax.jit
    def run(pts):
        ptsT = pts.T                                                  # (C, P)
        pts_k1 = jnp.full((C, P_pad), pad_val, jnp.float32).at[:, :P].set(ptsT)
        pts_feat = jnp.zeros((C, P_pad), jnp.float32).at[:, :P].set(ptsT)

        # ---- kernel 1: per-point linearized voxel ids ------------------------
        pid = pl.pallas_call(
            k1,
            out_shape=jax.ShapeDtypeStruct((1, P_pad), jnp.int32),
            grid_spec=pltpu.PrefetchScalarGridSpec(
                num_scalar_prefetch=0,
                grid=(P_pad // TP,),
                in_specs=[pl.BlockSpec((C, TP), lambda i: (0, i))],
                out_specs=pl.BlockSpec((1, TP), lambda i: (0, i))),
            compiler_params=pltpu.CompilerParams(
                dimension_semantics=("parallel",)),
        )(pts_k1)
        pid = pid.reshape(-1)                                         # (P_pad,)

        # ---- sort points by voxel id (stable -> keeps original point order) --
        order = jnp.argsort(pid)                        # stable in JAX
        spid = pid[order]                                             # (P_pad,)
        spts = jnp.take(pts_feat, order, axis=1)                      # (C, P_pad)
        pts3 = spts.reshape(C, n_chunks_tot, PC).transpose(1, 0, 2)   # chunk-major

        # ---- unique voxel ids + per-voxel point ranges (XLA side) ------------
        uniq, counts = jnp.unique(spid, return_counts=True,
                                  size=N_pad, fill_value=INV)
        uniq = uniq.astype(jnp.int32)
        starts = jnp.searchsorted(spid, uniq, side='left').astype(jnp.int32)
        valid = uniq < INV
        n_valid = jnp.sum(valid).astype(jnp.int32)
        cnt = (jnp.minimum(counts.astype(jnp.int32), M)
               * valid.astype(jnp.int32))                             # (N_pad,)

        vx = uniq // (gy * gz)
        vy = (uniq // gz) % gy
        vz = uniq % gz
        coords = jnp.stack([vx, vy, vz], axis=1).astype(jnp.int32)

        # ---- per output slot: sorted-point index it copies (dummy -> zeros) --
        slot = jnp.arange(M, dtype=jnp.int32)[None, :]                # (1, M)
        src = starts[:, None] + slot                                  # (N_pad, M)
        src = jnp.where(slot < cnt[:, None], src, P_pad - 1)
        src = src.reshape(1, N_pad * M).astype(jnp.int32)

        # ---- per grid-step point-chunk ranges (scalar prefetch) --------------
        ends = starts + cnt
        blk_lo = starts.reshape(n_blocks, V)[:, 0]
        blk_hi = ends.reshape(n_blocks, V)[:, -1]
        chunk_lo = (blk_lo // PC).astype(jnp.int32)
        chunk_hi = ((blk_hi + PC - 1) // PC).astype(jnp.int32)

        # ---- kernel 2: scatter points into the (C, N_pad*M) slab -------------
        vox_cm = pl.pallas_call(
            k2,
            out_shape=jax.ShapeDtypeStruct((C, N_pad * M), jnp.float32),
            grid_spec=pltpu.PrefetchScalarGridSpec(
                num_scalar_prefetch=2,
                grid=(n_blocks,),
                in_specs=[
                    pl.BlockSpec((1, TJ), lambda i, lo, hi: (0, i)),
                    pl.BlockSpec((n_chunks_tot, C, PC),
                                 lambda i, lo, hi: (0, 0, 0)),
                ],
                out_specs=pl.BlockSpec((C, TJ), lambda i, lo, hi: (0, i))),
            compiler_params=pltpu.CompilerParams(
                dimension_semantics=("parallel",),
                vmem_limit_bytes=vmem_limit),
        )(chunk_lo, chunk_hi, src, pts3)

        vox = vox_cm.reshape(C, N_pad, M).transpose(1, 2, 0)          # (N_pad,M,C)
        return vox, coords, cnt, n_valid

    vox, coords, cnt, n_valid = run(points)

    # ---- trim to the data-dependent voxel count (single host sync) ----------
    # TODO(synk): the true voxel count N is data dependent (torch.unique); one
    # host sync at the very end trims the statically padded outputs.
    N = int(jax.device_get(n_valid))
    return vox[:N], coords[:N], cnt[:N]


# ----------------------------------------------------------------------------
# NumPy mirror of the PyTorch Voxelization.forward (for checking)
# ----------------------------------------------------------------------------
def voxelization_reference(points, voxel_size, point_cloud_range, max_num_points):
    points = np.asarray(points, np.float32)
    vs = np.asarray(voxel_size, np.float32)
    rng = np.asarray(point_cloud_range, np.float32)
    grid_size = np.round((rng[3:] - rng[:3]) / vs).astype(np.int32)
    coords = np.floor((points[:, :3] - rng[:3]) / vs).astype(np.int32)
    mask = np.all(coords >= 0, axis=1) & np.all(coords < grid_size, axis=1)
    pv = points[mask]
    cv = coords[mask]
    uniq = np.unique(cv, axis=0)
    N = uniq.shape[0]
    vox = np.zeros((N, max_num_points, points.shape[1]), np.float32)
    cnt = np.zeros((N,), np.int32)
    for idx, c in enumerate(uniq):
        child = pv[np.all(cv == c, axis=1)]
        n = min(child.shape[0], max_num_points)
        vox[idx, :n] = child[:n]
        cnt[idx] = n
    return vox, uniq.astype(np.int32), cnt


if __name__ == "__main__":
    voxel_size = [2.0, 2.0, 4.0]
    point_cloud_range = [0.0, -8.0, -3.0, 16.0, 8.0, 1.0]   # grid = (8, 8, 1)
    max_num_points = 32
    max_voxels = (1000, 1000)   # parity only; forward never uses it

    key = jax.random.PRNGKey(0)
    ka, kb, kc = jax.random.split(key, 3)

    # 216 scattered points (some intentionally outside the crop range) ...
    low = jnp.array([-1.0, -9.0, -4.0], jnp.float32)
    high = jnp.array([17.0, 9.0, 2.0], jnp.float32)
    xyz_a = jax.random.uniform(ka, (216, 3), jnp.float32) * (high - low) + low
    # ... plus a 40-point cluster in one pillar to exercise the max-points cap.
    xyz_b = (jnp.array([1.0, -1.0, -1.0], jnp.float32)
             + 0.2 * jax.random.uniform(kb, (40, 3), jnp.float32))
    xyz = jnp.concatenate([xyz_a, xyz_b], axis=0)
    refl = jax.random.uniform(kc, (256, 1), jnp.float32)
    points = jnp.concatenate([xyz, refl], axis=1)            # (256, 4) [x, y, z, r]

    vox, coords, cnt = voxelize(points, voxel_size, point_cloud_range,
                                max_num_points)
    vox, coords, cnt = jax.block_until_ready((vox, coords, cnt))

    vox_ref, coords_ref, cnt_ref = voxelization_reference(
        np.asarray(points), voxel_size, point_cloud_range, max_num_points)

    np.testing.assert_array_equal(np.asarray(coords), coords_ref)
    np.testing.assert_array_equal(np.asarray(cnt), cnt_ref)
    np.testing.assert_allclose(np.asarray(vox), vox_ref, rtol=0.0, atol=0.0)
    print("KERNEL_OK")
</pallas_src>

<mosaic_0001>
module attributes {stable_mosaic.version = 11 : i64} {
  func.func private @main(%arg0: i32) attributes {dimension_semantics = [#tpu.dimension_semantics<core_parallel>], iteration_bounds = array<i64: 2>, tpu.core_type = #tpu.core_type<sc_scalar_subcore>, window_params = []} {
    return
  }
}

module attributes {stable_mosaic.version = 11 : i64} {
  func.func private @main(%arg0: i32) attributes {dimension_semantics = [#tpu.dimension_semantics<core_parallel>], iteration_bounds = array<i64: 2>, tpu.core_type = #tpu.core_type<sc_scalar_subcore>, window_params = []} {
    return
  }
}

module attributes {stable_mosaic.version = 11 : i64} {
  func.func @_point_ids_kernel(%arg0: i32, %arg1: memref<4x384xf32, #tpu.memory_space<vmem>>, %arg2: memref<1x384xi32, #tpu.memory_space<vmem>>) attributes {dimension_semantics = [#tpu.dimension_semantics<parallel>], iteration_bounds = array<i64: 1>, scalar_prefetch = 0 : i64, scratch_operands = 0 : i64, tpu.core_type = #tpu.core_type<tc>, window_params = [{transform_indices = @transform_0, window_bounds = array<i64: 4, 384>}, {transform_indices = @transform_1, window_bounds = array<i64: 1, 384>}]} {
    %c0 = arith.constant 0 : index
    %c0_0 = arith.constant 0 : index
    %0 = vector.load %arg1[%c0, %c0_0] : memref<4x384xf32, #tpu.memory_space<vmem>>, vector<1x384xf32>
    %c1 = arith.constant 1 : index
    %c0_1 = arith.constant 0 : index
    %1 = vector.load %arg1[%c1, %c0_1] : memref<4x384xf32, #tpu.memory_space<vmem>>, vector<1x384xf32>
    %c2 = arith.constant 2 : index
    %c0_2 = arith.constant 0 : index
    %2 = vector.load %arg1[%c2, %c0_2] : memref<4x384xf32, #tpu.memory_space<vmem>>, vector<1x384xf32>
    %cst = arith.constant 0.000000e+00 : f32
    %3 = vector.broadcast %cst : f32 to vector<1x384xf32>
    %4 = arith.subf %0, %3 : vector<1x384xf32>
    %cst_3 = arith.constant 2.000000e+00 : f32
    %5 = vector.broadcast %cst_3 : f32 to vector<1x384xf32>
    %6 = arith.divf %4, %5 : vector<1x384xf32>
    %7 = math.floor %6 : vector<1x384xf32>
    %8 = arith.fptosi %7 : vector<1x384xf32> to vector<1x384xi32>
    %cst_4 = arith.constant -8.000000e+00 : f32
    %9 = vector.broadcast %cst_4 : f32 to vector<1x384xf32>
    %10 = arith.subf %1, %9 : vector<1x384xf32>
    %cst_5 = arith.constant 2.000000e+00 : f32
    %11 = vector.broadcast %cst_5 : f32 to vector<1x384xf32>
    %12 = arith.divf %10, %11 : vector<1x384xf32>
    %13 = math.floor %12 : vector<1x384xf32>
    %14 = arith.fptosi %13 : vector<1x384xf32> to vector<1x384xi32>
    %cst_6 = arith.constant -3.000000e+00 : f32
    %15 = vector.broadcast %cst_6 : f32 to vector<1x384xf32>
    %16 = arith.subf %2, %15 : vector<1x384xf32>
    %cst_7 = arith.constant 4.000000e+00 : f32
    %17 = vector.broadcast %cst_7 : f32 to vector<1x384xf32>
    %18 = arith.divf %16, %17 : vector<1x384xf32>
    %19 = math.floor %18 : vector<1x384xf32>
    %20 = arith.fptosi %19 : vector<1x384xf32> to vector<1x384xi32>
    %c0_i32 = arith.constant 0 : i32
    %21 = vector.broadcast %c0_i32 : i32 to vector<1x384xi32>
    %22 = arith.cmpi sge, %8, %21 : vector<1x384xi32>
    %c0_i32_8 = arith.constant 0 : i32
    %23 = vector.broadcast %c0_i32_8 : i32 to vector<1x384xi32>
    %24 = arith.cmpi sge, %14, %23 : vector<1x384xi32>
    %25 = arith.andi %22, %24 : vector<1x384xi1>
    %c0_i32_9 = arith.constant 0 : i32
    %26 = vector.broadcast %c0_i32_9 : i32 to vector<1x384xi32>
    %27 = arith.cmpi sge, %20, %26 : vector<1x384xi32>
    %28 = arith.andi %25, %27 : vector<1x384xi1>
    %c8_i32 = arith.constant 8 : i32
    %29 = vector.broadcast %c8_i32 : i32 to vector<1x384xi32>
    %30 = arith.cmpi slt, %8, %29 : vector<1x384xi32>
    %31 = arith.andi %28, %30 : vector<1x384xi1>
    %c8_i32_10 = arith.constant 8 : i32
    %32 = vector.broadcast %c8_i32_10 : i32 to vector<1x384xi32>
    %33 = arith.cmpi slt, %14, %32 : vector<1x384xi32>
    %34 = arith.andi %31, %33 : vector<1x384xi1>
    %c1_i32 = arith.constant 1 : i32
    %35 = vector.broadcast %c1_i32 : i32 to vector<1x384xi32>
    %36 = arith.cmpi slt, %20, %35 : vector<1x384xi32>
    %37 = arith.andi %34, %36 : vector<1x384xi1>
    %c8_i32_11 = arith.constant 8 : i32
    %38 = vector.broadcast %c8_i32_11 : i32 to vector<1x384xi32>
    %39 = arith.muli %8, %38 : vector<1x384xi32>
    %40 = arith.addi %39, %14 : vector<1x384xi32>
    %c1_i32_12 = arith.constant 1 : i32
    %41 = vector.broadcast %c1_i32_12 : i32 to vector<1x384xi32>
    %42 = arith.muli %40, %41 : vector<1x384xi32>
    %43 = arith.addi %42, %20 : vector<1x384xi32>
    %c64_i32 = arith.constant 64 : i32
    %44 = vector.broadcast %c64_i32 : i32 to vector<1x384xi32>
    %45 = arith.select %37, %43, %44 : vector<1x384xi1>, vector<1x384xi32>
    %c0_13 = arith.constant 0 : index
    %c0_14 = arith.constant 0 : index
    %46 = vector.load %arg2[%c0_13, %c0_14] : memref<1x384xi32, #tpu.memory_space<vmem>>, vector<1x384xi32>
    tpu.vector_store %arg2[%c0_13, %c0_14], %45 {strides = array<i32>} : memref<1x384xi32, #tpu.memory_space<vmem>>, vector<1x384xi32>,
    return
  }
  func.func @transform_0(%arg0: i32) -> (i32, i32) {
    %c0_i32 = arith.constant 0 : i32
    %c0_i32_0 = arith.constant 0 : i32
    return %c0_i32, %arg0 : i32, i32
  }
  func.func @transform_1(%arg0: i32) -> (i32, i32) {
    %c0_i32 = arith.constant 0 : i32
    %c0_i32_0 = arith.constant 0 : i32
    return %c0_i32, %arg0 : i32, i32
  }
}

module attributes {stable_mosaic.version = 11 : i64} {
  func.func @_gather_kernel(%arg0: i32, %arg1: memref<2xi32, #tpu.memory_space<smem>>, %arg2: memref<2xi32, #tpu.memory_space<smem>>, %arg3: memref<1x2048xi32, #tpu.memory_space<vmem>>, %arg4: memref<3x4x128xf32, #tpu.memory_space<vmem>>, %arg5: memref<4x2048xf32, #tpu.memory_space<vmem>>) attributes {dimension_semantics = [#tpu.dimension_semantics<parallel>], iteration_bounds = array<i64: 2>, scalar_prefetch = 2 : i64, scratch_operands = 0 : i64, tpu.core_type = #tpu.core_type<tc>, window_params = [{transform_indices = @transform_0, window_bounds = array<i64: 1, 2048>}, {pipeline_mode = #tpu.pipeline_mode<synchronous>, transform_indices = @transform_1, window_bounds = array<i64: 3, 4, 128>}, {transform_indices = @transform_2, window_bounds = array<i64: 4, 2048>}]} {
    %0 = arith.index_cast %arg0 : i32 to index
    %1 = memref.load %arg1[%0] : memref<2xi32, #tpu.memory_space<smem>>
    %2 = arith.index_cast %arg0 : i32 to index
    %3 = memref.load %arg2[%2] : memref<2xi32, #tpu.memory_space<smem>>
    %c0 = arith.constant 0 : index
    %c0_0 = arith.constant 0 : index
    %4 = vector.load %arg3[%c0, %c0_0] : memref<1x2048xi32, #tpu.memory_space<vmem>>, vector<1x2048xi32>
    %5 = tpu.iota {dimensions = array<i32: 0>} : vector<128x1xi32>
    %cst = arith.constant 0.000000e+00 : f32
    %6 = vector.broadcast %cst : f32 to vector<4x2048xf32>
    %7 = arith.subi %3, %1 : i32
    %8 = arith.addi %1, %7 : i32
    %c1_i32 = arith.constant 1 : i32
    %9 = scf.for %arg6 = %1 to %8 step %c1_i32 iter_args(%arg7 = %6) -> (vector<4x2048xf32>)  : i32 {
      %c128_i32 = arith.constant 128 : i32
      %11 = arith.muli %arg6, %c128_i32 : i32
      %12 = vector.broadcast %11 : i32 to vector<128x1xi32>
      %13 = arith.addi %5, %12 : vector<128x1xi32>
      %14 = vector.broadcast %4 : vector<1x2048xi32> to vector<128x2048xi32>
      %15 = vector.broadcast %13 : vector<128x1xi32> to vector<128x2048xi32>
      %16 = arith.cmpi eq, %14, %15 : vector<128x2048xi32>
      %17 = arith.extui %16 : vector<128x2048xi1> to vector<128x2048xi32>
      %18 = arith.sitofp %17 : vector<128x2048xi32> to vector<128x2048xf32>
      %19 = arith.truncf %18 : vector<128x2048xf32> to vector<128x2048xbf16>
      %20 = arith.index_cast %arg6 : i32 to index
      %c0_3 = arith.constant 0 : index
      %c0_4 = arith.constant 0 : index
      %21 = vector.load %arg4[%20, %c0_3, %c0_4] : memref<3x4x128xf32, #tpu.memory_space<vmem>>, vector<1x4x128xf32>
      %22 = vector.shape_cast %21 : vector<1x4x128xf32> to vector<4x128xf32>
      %23 = arith.truncf %22 : vector<4x128xf32> to vector<4x128xbf16>
      %24 = arith.extf %23 : vector<4x128xbf16> to vector<4x128xf32>
      %25 = arith.subf %22, %24 : vector<4x128xf32>
      %26 = arith.truncf %25 : vector<4x128xf32> to vector<4x128xbf16>
      %27 = arith.extf %26 : vector<4x128xbf16> to vector<4x128xf32>
      %28 = arith.subf %25, %27 : vector<4x128xf32>
      %29 = arith.truncf %28 : vector<4x128xf32> to vector<4x128xbf16>
      %30 = tpu.concatenate %23, %26, %29 in 0 : vector<4x128xbf16>, vector<4x128xbf16>, vector<4x128xbf16> -> vector<12x128xbf16>
      %cst_5 = arith.constant dense<0.000000e+00> : vector<12x2048xf32>
      %31 = tpu.matmul %30, %19, %cst_5 {dimension_numbers = #tpu.dot_dimension_numbers<[1], [0], [0], [1], [0, 0, 1, 1], [], []>} : vector<12x128xbf16>, vector<128x2048xbf16>, vector<12x2048xf32> -> vector<12x2048xf32>
      %32 = vector.extract_strided_slice %31 {offsets = [0, 0], sizes = [4, 2048], strides = [1, 1]} : vector<12x2048xf32> to vector<4x2048xf32>
      %33 = vector.extract_strided_slice %31 {offsets = [4, 0], sizes = [4, 2048], strides = [1, 1]} : vector<12x2048xf32> to vector<4x2048xf32>
      %34 = arith.addf %32, %33 : vector<4x2048xf32>
      %35 = vector.extract_strided_slice %31 {offsets = [8, 0], sizes = [4, 2048], strides = [1, 1]} : vector<12x2048xf32> to vector<4x2048xf32>
      %36 = arith.addf %34, %35 : vector<4x2048xf32>
      %37 = arith.addf %arg7, %36 : vector<4x2048xf32>
      scf.yield %37 : vector<4x2048xf32>
    }
    %c0_1 = arith.constant 0 : index
    %c0_2 = arith.constant 0 : index
    %10 = vector.load %arg5[%c0_1, %c0_2] : memref<4x2048xf32, #tpu.memory_space<vmem>>, vector<4x2048xf32>
    tpu.vector_store %arg5[%c0_1, %c0_2], %9 {strides = array<i32>} : memref<4x2048xf32, #tpu.memory_space<vmem>>, vector<4x2048xf32>,
    return
  }
  func.func @transform_0(%arg0: i32, %arg1: memref<2xi32, #tpu.memory_space<smem>>, %arg2: memref<2xi32, #tpu.memory_space<smem>>) -> (i32, i32) {
    %c0_i32 = arith.constant 0 : i32
    %c0_i32_0 = arith.constant 0 : i32
    return %c0_i32, %arg0 : i32, i32
  }
  func.func @transform_1(%arg0: i32, %arg1: memref<2xi32, #tpu.memory_space<smem>>, %arg2: memref<2xi32, #tpu.memory_space<smem>>) -> (i32, i32, i32) {
    %c0_i32 = arith.constant 0 : i32
    %c0_i32_0 = arith.constant 0 : i32
    %c0_i32_1 = arith.constant 0 : i32
    %c0_i32_2 = arith.constant 0 : i32
    return %c0_i32, %c0_i32_0, %c0_i32_1 : i32, i32, i32
  }
  func.func @transform_2(%arg0: i32, %arg1: memref<2xi32, #tpu.memory_space<smem>>, %arg2: memref<2xi32, #tpu.memory_space<smem>>) -> (i32, i32) {
    %c0_i32 = arith.constant 0 : i32
    %c0_i32_0 = arith.constant 0 : i32
    return %c0_i32, %arg0 : i32, i32
  }
}

</mosaic_0001>

<bundles_post_ra>
// kernel: custom-call.1
= control target key start
LH: loop header
LB: loop body
LE: loop exit
PB: predicated region body
PF: predicated region fallthrough
CT: control target
= control target key end

     0   :  { %s6_s0 = inlined_call_operand.vmem [shape: u32[128], index: 0, kind: output, shape index: {}]  }

// kernel: run.2
= control target key start
LH: loop header
LB: loop body
LE: loop exit
PB: predicated region body
PF: predicated region fallthrough
CT: control target
= control target key end

     0   :  { %v41_v19 = vlaneseq  ;;  %s82_s0 = inlined_call_operand.vmem [shape: f32[4,384], index: 0, kind: input, shape index: {}]   ;;  %s83_s1 = inlined_call_operand.vmem [shape: s32[1,384], index: 1, kind: output, shape index: {}]  }
   0x1   :  { %v8_v0 = vld [vmem:[%s82_s0] ss:$4 sm:$0x7]  ;;  %v50_v1 = vld [vmem:[%s82_s0 + $0x1] ss:$4 sm:$0x7] }
   0x2   :  { %v51_v2 = vld [vmem:[%s82_s0 + $0x2] ss:$4 sm:$0x7]  ;;  %v14_v3 = vmul.f32 0.5, %v8_v0  ;;  %v52_v4 = vadd.f32 8.0, %v50_v1  ;;  %vm43_vm10 = vcmp.lt.s32.totalorder %v41_v19, 384 }
   0x3   :  { %v53_v5 = vadd.f32 3.0, %v51_v2 }
   0x4   :  { %v15_v6 = vfloor.f32 %v14_v3  ;;  %v18_v7 = vmul.f32 0.5, %v52_v4 }
   0x5   :  { %v23_v8 = vmul.f32 0.25, %v53_v5 }
   0x6   :  { %v54_v9 = vtrunc.f32 %v15_v6  ;;  %v19_v10 = vfloor.f32 %v18_v7 }
   0x7   :  { %v24_v11 = vfloor.f32 %v23_v8 }
   0x8   :  { %v55_v12 = vcvt.f32.s32 %v54_v9  ;;  %v56_v13 = vtrunc.f32 %v19_v10 }
   0x9   :  { %v58_v14 = vtrunc.f32 %v24_v11 }
   0xa   :  { %v57_v15 = vcvt.f32.s32 %v56_v13  ;;  %vm26_vm0 = vcmp.ge.s32.totalorder %v55_v12, 0  ;;  %v37_v16 = vmul.u32 8, %v55_v12  ;;  %vm31_vm2 = vcmp.lt.s32.totalorder %v55_v12, 8 }
   0xb   :  { %v59_v17 = vcvt.f32.s32 %v58_v14 }
   0xc   :  { %vm27_vm1 = vcmp.ge.s32.totalorder %v57_v15, 0  ;;  %v38_v18 = vadd.s32 %v57_v15, %v37_v16  ;;  %vm33_vm5 = vcmp.lt.s32.totalorder %v57_v15, 8 }
   0xd   :  { %vm28_vm3 = vmand %vm26_vm0, %vm27_vm1  ;;  %vm29_vm4 = vcmp.ge.s32.totalorder %v59_v17, 0  ;;  %vm35_vm7 = vcmp.lt.s32.totalorder %v59_v17, 1 }
   0xe   :  { %vm30_vm6 = vmand %vm28_vm3, %vm29_vm4  ;;  %v39_v20 = vadd.s32 %v59_v17, %v38_v18 }
   0xf   :  { %vm32_vm8 = vmand %vm30_vm6, %vm31_vm2 }
  0x10   :  { %vm34_vm9 = vmand %vm32_vm8, %vm33_vm5 }
  0x11   :  { %vm36_vm11 = vmand %vm34_vm9, %vm35_vm7 }
  0x12   :  { %v40_v21 = vsel %vm36_vm11, %v39_v20, 64 }
  0x13   :  { %45 = vst.msk [vmem:[%s83_s1] sm:$0x7] %vm43_vm10, %v40_v21 }

// kernel: run.3
= control target key start
LH: loop header
LB: loop body
LE: loop exit
PB: predicated region body
PF: predicated region fallthrough
CT: control target
= control target key end

     0   :  { %s4744_s0 = inlined_call_operand.vmem [shape: s32[2], index: 0, kind: input, shape index: {}]   ;;  %s4745_s2 = inlined_call_operand.vmem [shape: s32[1,4096], index: 2, kind: input, shape index: {}]   ;;  %s4746_s3 = inlined_call_operand.vmem [shape: f32[3,4,128], index: 3, kind: input, shape index: {}]   ;;  %s4747_s4 = inlined_call_operand.vmem [shape: f32[4,4096], index: 4, kind: output, shape index: {}]   ;;  %s4748_s1 = inlined_call_operand.vmem [shape: s32[2], index: 1, kind: input, shape index: {}]  }
   0x1   :  { %s9_s17 = sshll.u32 %s4744_s0, 4  ;;  %s13_s20 = sshll.u32 %s4748_s1, 4  ;;  %s10_s17 = int_to_ptr.vmem [resolvable:$true] %s9_s17  ;;  %s14_s20 = int_to_ptr.vmem [resolvable:$true] %s13_s20 }
   0x2   :  { %s2588_s21 = scalar_lea.vmem %s10_s17, 16  ;;  %p2593_p1 = scmp.lt.s32.totalorder %s10_s17, %s10_s17 }
   0x3   :  { %p2589_p0 = scmp.ne.s32.totalorder %s10_s17, %s2588_s21  ;;  %p2594_p2 = scmp.lt.s32.totalorder %s2588_s21, %s2588_s21 }
   0x5   :  { %p2595_p3 = por %p2594_p2, %p2593_p1 }
   0x7   :  { %p2596_p4 = pnand %p2595_p3, %p2589_p0 }
   0x9   :  { %2599 = shalt.err (!%p2596_p4)  }
   0xa   :  { %s2886_s22 = smov [#allocation3]   ;;  %s2600_s23 = scalar_lea.vmem %s14_s20, 16 }
   0xb   :  { %12 = dma.vmem_to_smem %s10_s17, 16, %s2886_s22, [#allocation2] }
   0xc   :  { %p2601_p5 = scmp.ne.s32.totalorder %s14_s20, %s2600_s23  ;;  %p2605_p6 = scmp.lt.s32.totalorder %s14_s20, %s14_s20 }
   0xd   :  { %p2606_p7 = scmp.lt.s32.totalorder %s2600_s23, %s2600_s23 }
   0xf   :  { %p2607_p8 = por %p2606_p7, %p2605_p6 }
  0x11   :  { %p2608_p9 = pnand %p2607_p8, %p2601_p5 }
  0x13   :  { %2611 = shalt.err (!%p2608_p9)  }
  0x14   :  { %s2887_s0 = smov [#allocation4]  }
  0x15   :  { %16 = dma.vmem_to_smem %s14_s20, 16, %s2887_s0, [#allocation2] }
  0x16   :  { %2748 = dma.done.wait [#allocation2], 32 }
  0x17   :  { %2749 = vsyncadd [#allocation2], 4294967264 }
  0x18   :  { %18 = sfence }
  0x19   :  { %s2921_s1 = smov 0  }
  0x1a LB: > { %s1788_s24 = sadd.s32 4294967295, %s2752_s1   ;;  %p1792_p10 = scmp.ge.s32.totalorder %s2752_s1, 1  ;;  %s2752_s1 = sphi %s2921_s1, %s24_s1  }
  0x1b   : > { %p124_p11 = scmp.lt.s32.totalorder %s2752_s1, 3 }
  0x1d   : > { %p125_p12 = pnand %p1792_p10, %p124_p11 }
  0x1f   : > { %128 = sbr.rel (%p125_p12) target bundleno = 420 (0x1a4), region = 28 }
  0x26   : > { %s1793_s25 = sshll.u32 %s1788_s24, 4  ;;  %s2929_s26 = sld [smem:[#allocation3 + %s1788_s24]]   ;;  %v161_v0 = vlaneseq  ;;  %v2994_v19 = vmov 0.0   ;;  %v2996_v20 = vmov 0.0   ;;  %v2998_v21 = vmov 0.0  }
  0x27   : > { %p146_p13 = scmp.lt.s32.totalorder %s1793_s25, 31  ;;  %s2931_s27 = sld [smem:[#allocation4 + %s1788_s24]]  ;;  %v3000_v22 = vmov 0.0   ;;  %v3002_v23 = vmov 0.0   ;;  %v3004_v24 = vmov 0.0   ;;  %v3006_v25 = vmov 0.0  }
  0x28   : > { %v2933_v1 = vshrl.u32 %v161_v0, 7  ;;  %v3008_v26 = vmov 0.0   ;;  %v3010_v27 = vmov 0.0   ;;  %v3012_v28 = vmov 0.0  }
  0x29   : > { %s4976_s25 = smov (!%p146_p13, %s1793_s25), 31  ;;  %v3014_v29 = vmov 0.0   ;;  %v3016_v30 = vmov 0.0   ;;  %v3018_v31 = vmov 0.0   ;;  %v3020_v32 = vmov 0.0  }
  0x2a   : > { %v2936_v2 = vadd.s32 8, %v2933_v1  ;;  %v2939_v3 = vadd.s32 16, %v2933_v1  ;;  %v2942_v4 = vadd.s32 24, %v2933_v1  ;;  %v2945_v5 = vadd.s32 32, %v2933_v1  ;;  %s148_s30 = scalar_lea.vmem %s4745_s2, %s4976_s25  ;;  %s1795_s5 = sshll.u32 %s4976_s25, 2 }
  0x2b   : > { %v2951_v6 = vadd.s32 40, %v2933_v1  ;;  %v2954_v7 = vadd.s32 48, %v2933_v1  ;;  %v2957_v8 = vadd.s32 56, %v2933_v1  ;;  %v2960_v9 = vadd.s32 64, %v2933_v1  ;;  %s2965_s8 = scalar_lea.vmem %s4747_s4, %s1795_s5  ;;  %v2967_v10 = vld [vmem:[%s148_s30] sm:$0xff]  ;;  %v2969_v11 = vld [vmem:[%s148_s30 + $0x8] sm:$0xff] }
  0x2c   : > { %4760 = vst [vmem:[#allocation6_spill] sm:$0xff] %v2936_v2  ;;  %4761 = vst [vmem:[#allocation7_spill] sm:$0xff] %v2939_v3  ;;  %v2972_v12 = vadd.s32 72, %v2933_v1  ;;  %v2975_v13 = vadd.s32 80, %v2933_v1  ;;  %v2978_v14 = vadd.s32 88, %v2933_v1  ;;  %v2981_v15 = vadd.s32 96, %v2933_v1 }
  0x2d   : > { %4762 = vst [vmem:[#allocation8_spill] sm:$0xff] %v2942_v4  ;;  %4763 = vst [vmem:[#allocation9_spill] sm:$0xff] %v2945_v5  ;;  %v2984_v16 = vadd.s32 104, %v2933_v1  ;;  %v2987_v17 = vadd.s32 112, %v2933_v1  ;;  %v2990_v18 = vadd.s32 120, %v2933_v1  ;;  %p1716_p0 = scmp.ge.s32.totalorder %s2929_s26, %s2931_s27  ;;  %v3022_v33 = vmov 0.0  }
  0x2e   : > { %4764 = vst [vmem:[#allocation10_spill] sm:$0xff] %v2951_v6  ;;  %4765 = vst [vmem:[#allocation11_spill] sm:$0xff] %v2954_v7  ;;  %v3024_v34 = vmov 0.0   ;;  %v3029_v35 = vmov (!%p1716_p0), 0.0   ;;  %v3031_v36 = vmov (!%p1716_p0), 0.0   ;;  %v3033_v37 = vmov (!%p1716_p0), 0.0  }
  0x2f   : > { %1733 = sbr.rel (%p1716_p0) target bundleno = 414 (0x19e), region = 60  ;;  %v3035_v38 = vmov (!%p1716_p0), 0.0   ;;  %v3037_v39 = vmov (!%p1716_p0), 0.0   ;;  %v3039_v40 = vmov (!%p1716_p0), 0.0   ;;  %v3041_v41 = vmov (!%p1716_p0), 0.0  }
  0x30   : > { %v3043_v42 = vmov (!%p1716_p0), 0.0   ;;  %v3045_v43 = vmov (!%p1716_p0), 0.0   ;;  %v3047_v44 = vmov (!%p1716_p0), 0.0   ;;  %v3049_v45 = vmov (!%p1716_p0), 0.0  }
  0x31   : > { %v3051_v46 = vmov (!%p1716_p0), 0.0   ;;  %v3053_v47 = vmov (!%p1716_p0), 0.0   ;;  %v3055_v48 = vmov (!%p1716_p0), 0.0   ;;  %v3057_v49 = vmov (!%p1716_p0), 0.0  }
  0x32   : > { %v3059_v50 = vmov (!%p1716_p0), 0.0  }
  0x36 LB: >> { %v4754_v51 = vsub.s32 1, %v2933_v1  ;;  %v4753_v52 = vsub.s32 3, %v2933_v1  ;;  %v4752_v53 = vsub.s32 0, %v2933_v1  ;;  %v4749_v54 = vsub.s32 2, %v2933_v1  ;;  %s1796_s9 = sshll.u32 %s2820_s26, 7  ;;  %v4766_v2 = vld [vmem:[#allocation6_spill] sm:$0xff]  ;;  %s2820_s26 = sphi %s2929_s26, %s181_s26   ;;  %v2816_v50 = vphi %v3059_v50, %v4959_v50   ;;  %v2812_v49 = vphi %v3057_v49, %v4958_v49   ;;  %v2808_v48 = vphi %v3055_v48, %v4957_v48   ;;  %v2804_v47 = vphi %v3053_v47, %v4956_v47   ;;  %v2800_v46 = vphi %v3051_v46, %v4955_v46   ;;  %v2796_v45 = vphi %v3049_v45, %v4954_v45   ;;  %v2792_v44 = vphi %v3047_v44, %v4953_v44   ;;  %v2788_v43 = vphi %v3045_v43, %v4952_v43   ;;  %v2784_v42 = vphi %v3043_v42, %v4951_v42   ;;  %v2780_v41 = vphi %v3041_v41, %v4950_v41   ;;  %v2776_v40 = vphi %v3039_v40, %v4949_v40   ;;  %v2772_v39 = vphi %v3037_v39, %v4948_v39   ;;  %v2768_v38 = vphi %v3035_v38, %v4947_v38   ;;  %v2764_v37 = vphi %v3033_v37, %v4946_v37   ;;  %v2760_v36 = vphi %v3031_v36, %v4945_v36   ;;  %v2756_v35 = vphi %v3029_v35, %v4944_v35  }
  0x37   : >> { %v4750_v57 = vmov 0   ;;  %v3132_v58 = vstv %s1796_s9  ;;  %v4767_v3 = vld [vmem:[#allocation7_spill] sm:$0xff]  ;;  %v4768_v4 = vld [vmem:[#allocation8_spill] sm:$0xff]  ;;  %v4758_v19 = vmov 1.0|1.0   ;;  %v4769_v5 = vld [vmem:[#allocation9_spill] sm:$0xff] }
  0x38   : >> { %v3123_v55 = vrot.slane %v2967_v10, %v4754_v51  ;;  %v3128_v56 = vrot.slane %v2967_v10, %v4753_v52  ;;  %1232 = vmatprep.mubr.bf16.mxu0 %v4750_v57  ;;  %1275 = vmatprep.mubr.bf16.mxu1 %v4750_v57  ;;  %v3137_v59 = vrot.slane %v2967_v10, %v4752_v53  ;;  %v4770_v6 = vld [vmem:[#allocation10_spill] sm:$0xff]  ;;  %v4771_v7 = vld [vmem:[#allocation11_spill] sm:$0xff]  ;;  %s2053_s10 = sshll.u32 %s2820_s26, 2  ;;  %v4755_v30 = vsub.s32 5, %v2933_v1  ;;  %s181_s26 = sadd.s32 1, %s2820_s26  }
  0x39   : >> { %v3142_v60 = vrot.slane %v2967_v10, %v4749_v54  ;;  %v3146_v61 = vadd.s32 %v3132_v58, %v2933_v1  ;;  %v3150_v62 = vadd.s32 %v3132_v58, %v4766_v2  ;;  %v3154_v63 = vadd.s32 %v3132_v58, %v4767_v3  ;;  %s1179_s13 = scalar_lea.vmem %s4746_s3, %s2053_s10  ;;  %p4629_p1 = scmp.ge.s32.totalorder %s181_s26, %s2931_s27 }
  0x3a   : >> { %v3158_v0 = vadd.s32 %v3132_v58, %v4768_v4  ;;  %v3183_v20 = vadd.s32 %v3132_v58, %v4769_v5  ;;  %v3187_v21 = vadd.s32 %v3132_v58, %v4770_v6  ;;  %v3211_v22 = vadd.s32 %v3132_v58, %v4771_v7  ;;  %v1180_v28 = vld [vmem:[%s1179_s13] sm:$0xf] }
  0x3b   : >> { %vm283_vm0 = vcmp.eq.s32.totalorder %v3123_v55, %v3146_v61  ;;  %vm299_vm1 = vcmp.eq.s32.totalorder %v3123_v55, %v3150_v62  ;;  %vm285_vm2 = vcmp.eq.s32.totalorder %v3128_v56, %v3146_v61  ;;  %vm301_vm3 = vcmp.eq.s32.totalorder %v3128_v56, %v3150_v62 }
  0x3c   : >> { %vm2054_vm4 = vmpackc.low %vm299_vm1, %vm283_vm0  ;;  %vm282_vm5 = vcmp.eq.s32.totalorder %v3137_v59, %v3146_v61  ;;  %vm298_vm6 = vcmp.eq.s32.totalorder %v3137_v59, %v3150_v62  ;;  %vm284_vm7 = vcmp.eq.s32.totalorder %v3142_v60, %v3146_v61  ;;  %vm300_vm8 = vcmp.eq.s32.totalorder %v3142_v60, %v3150_v62 }
  0x3d   : >> { %2055 = vmatprep.subr.msk.bf16.mxu0 %vm2054_vm4, %v4758_v19  ;;  %vm2086_vm9 = vmpackc.low %vm301_vm3, %vm285_vm2  ;;  %vm315_vm10 = vcmp.eq.s32.totalorder %v3123_v55, %v3154_v63  ;;  %vm331_vm11 = vcmp.eq.s32.totalorder %v3123_v55, %v3158_v0  ;;  %vm317_vm13 = vcmp.eq.s32.totalorder %v3128_v56, %v3154_v63  ;;  %vm333_vm14 = vcmp.eq.s32.totalorder %v3128_v56, %v3158_v0 }
  0x3e   : >> { %2087 = vmatprep.subr.msk.bf16.mxu1 %vm2086_vm9, %v4758_v19  ;;  %vm2056_vm12 = vmpackc.low %vm298_vm6, %vm282_vm5  ;;  %vm314_vm0 = vcmp.eq.s32.totalorder %v3137_v59, %v3154_v63  ;;  %vm330_vm1 = vcmp.eq.s32.totalorder %v3137_v59, %v3158_v0  ;;  %vm316_vm3 = vcmp.eq.s32.totalorder %v3142_v60, %v3154_v63  ;;  %vm332_vm4 = vcmp.eq.s32.totalorder %v3142_v60, %v3158_v0 }
  0x3f   : >> { %2057 = vmatpush1.bf16.msk.msra.mxu0 %vm2056_vm12, %v4758_v19  ;;  %vm2088_vm15 = vmpackc.low %vm300_vm8, %vm284_vm7  ;;  %vm347_vm6 = vcmp.eq.s32.totalorder %v3123_v55, %v3183_v20  ;;  %vm363_vm7 = vcmp.eq.s32.totalorder %v3123_v55, %v3187_v21  ;;  %v3215_v23 = vadd.s32 %v3132_v58, %v2957_v8  ;;  %vm349_vm9 = vcmp.eq.s32.totalorder %v3128_v56, %v3183_v20 }
  0x40   : >> { %2089 = vmatpush1.bf16.msk.msra.mxu1 %vm2088_vm15, %v4758_v19  ;;  %vm2058_vm2 = vmpackc.low %vm331_vm11, %vm315_vm10  ;;  %vm365_vm10 = vcmp.eq.s32.totalorder %v3128_v56, %v3187_v21  ;;  %vm346_vm12 = vcmp.eq.s32.totalorder %v3137_v59, %v3183_v20  ;;  %vm348_vm15 = vcmp.eq.s32.totalorder %v3142_v60, %v3183_v20  ;;  %v3240_v24 = vadd.s32 %v3132_v58, %v2960_v9 }
  0x41   : >> { %2059 = vmatprep.subr.msk.bf16.mxu0 %vm2058_vm2, %v4758_v19  ;;  %vm2090_vm5 = vmpackc.low %vm333_vm14, %vm317_vm13  ;;  %vm362_vm13 = vcmp.eq.s32.totalorder %v3137_v59, %v3187_v21  ;;  %vm379_vm2 = vcmp.eq.s32.totalorder %v3123_v55, %v3211_v22  ;;  %v3244_v25 = vadd.s32 %v3132_v58, %v2972_v12  ;;  %v3271_v26 = vadd.s32 %v3132_v58, %v2975_v13 }
  0x42   : >> { %2091 = vmatprep.subr.msk.bf16.mxu1 %vm2090_vm5, %v4758_v19  ;;  %vm2060_vm8 = vmpackc.low %vm330_vm1, %vm314_vm0  ;;  %vm364_vm0 = vcmp.eq.s32.totalorder %v3142_v60, %v3187_v21  ;;  %vm381_vm5 = vcmp.eq.s32.totalorder %v3128_v56, %v3211_v22  ;;  %v3275_v27 = vadd.s32 %v3132_v58, %v2978_v14  ;;  %v3294_v29 = vadd.s32 %v3132_v58, %v2981_v15 }
  0x43   : >> { %2061 = vmatpush1.bf16.msk.msra.mxu0 %vm2060_vm8, %v4758_v19  ;;  %vm2092_vm11 = vmpackc.low %vm332_vm4, %vm316_vm3  ;;  %vm395_vm3 = vcmp.eq.s32.totalorder %v3123_v55, %v3215_v23  ;;  %vm378_vm8 = vcmp.eq.s32.totalorder %v3137_v59, %v3211_v22  ;;  %v3304_v31 = vadd.s32 %v3132_v58, %v2984_v16  ;;  %v3306_v32 = vpack.c.bf16 %v1180_v28, %v1180_v28 }
  0x44   : >> { %2093 = vmatpush1.bf16.msk.msra.mxu1 %vm2092_vm11, %v4758_v19  ;;  %vm2062_vm14 = vmpackc.low %vm363_vm7, %vm347_vm6  ;;  %vm397_vm6 = vcmp.eq.s32.totalorder %v3128_v56, %v3215_v23  ;;  %vm380_vm11 = vcmp.eq.s32.totalorder %v3142_v60, %v3211_v22  ;;  %v3318_v33 = vadd.s32 %v3132_v58, %v2987_v17  ;;  %v4756_v34 = vsub.s32 7, %v2933_v1 }
  0x45   : >> { %2063 = vmatprep.subr.msk.bf16.mxu0 %vm2062_vm14, %v4758_v19  ;;  %vm2094_vm1 = vmpackc.low %vm365_vm10, %vm349_vm9  ;;  %vm394_vm9 = vcmp.eq.s32.totalorder %v3137_v59, %v3215_v23  ;;  %vm411_vm14 = vcmp.eq.s32.totalorder %v3123_v55, %v3240_v24  ;;  %v3334_v54 = vadd.s32 %v3132_v58, %v2990_v18  ;;  %v1182_v57 = vunpack.c.l.bf16 %v3306_v32 }
  0x46   : >> { %2095 = vmatprep.subr.msk.bf16.mxu1 %vm2094_vm1, %v4758_v19  ;;  %vm2064_vm4 = vmpackc.low %vm362_vm13, %vm346_vm12  ;;  %vm396_vm12 = vcmp.eq.s32.totalorder %v3142_v60, %v3215_v23  ;;  %vm413_vm1 = vcmp.eq.s32.totalorder %v3128_v56, %v3240_v24  ;;  %v4757_v58 = vsub.s32 4, %v2933_v1  ;;  %v3405_v52 = vrot.slane %v2967_v10, %v4755_v30 }
  0x47   : >> { %2065 = vmatpush1.bf16.msk.msra.mxu0 %vm2064_vm4, %v4758_v19  ;;  %vm2096_vm7 = vmpackc.low %vm364_vm0, %vm348_vm15  ;;  %vm427_vm15 = vcmp.eq.s32.totalorder %v3123_v55, %v3244_v25  ;;  %vm410_vm4 = vcmp.eq.s32.totalorder %v3137_v59, %v3240_v24  ;;  %v1183_v53 = vsub.f32 %v1180_v28, %v1182_v57  ;;  %v3410_v51 = vrot.slane %v2967_v10, %v4756_v34 }
  0x48   : >> { %2097 = vmatpush1.bf16.msk.msra.mxu1 %vm2096_vm7, %v4758_v19  ;;  %vm2066_vm10 = vmpackc.low %vm395_vm3, %vm379_vm2  ;;  %vm429_vm2 = vcmp.eq.s32.totalorder %v3128_v56, %v3244_v25  ;;  %vm412_vm7 = vcmp.eq.s32.totalorder %v3142_v60, %v3240_v24  ;;  %v3426_v34 = vrot.slane %v2967_v10, %v4757_v58  ;;  %v4772_v2 = vsub.s32 6, %v2933_v1 }
  0x49   : >> { %2067 = vmatprep.subr.msk.bf16.mxu0 %vm2066_vm10, %v4758_v19  ;;  %vm2098_vm13 = vmpackc.low %vm397_vm6, %vm381_vm5  ;;  %vm426_vm5 = vcmp.eq.s32.totalorder %v3137_v59, %v3244_v25  ;;  %vm443_vm10 = vcmp.eq.s32.totalorder %v3123_v55, %v3271_v26  ;;  %v1184_v28 = vpack.c.bf16 %v1183_v53, %v1183_v53  ;;  %v4773_v4 = vsub.s32 1, %v2933_v1 }
  0x4a   : >> { %2099 = vmatprep.subr.msk.bf16.mxu1 %vm2098_vm13, %v4758_v19  ;;  %vm2068_vm0 = vmpackc.low %vm394_vm9, %vm378_vm8  ;;  %vm428_vm8 = vcmp.eq.s32.totalorder %v3142_v60, %v3244_v25  ;;  %vm445_vm13 = vcmp.eq.s32.totalorder %v3128_v56, %v3271_v26  ;;  %v3442_v58 = vrot.slane %v2967_v10, %v4772_v2  ;;  %v4776_v7 = vmov 1.0|1.0  }
  0x4b   : >> { %2069 = vmatpush1.bf16.msk.msra.mxu0 %vm2068_vm0, %v4758_v19  ;;  %vm2100_vm3 = vmpackc.low %vm396_vm12, %vm380_vm11  ;;  %vm459_vm11 = vcmp.eq.s32.totalorder %v3123_v55, %v3275_v27  ;;  %vm442_vm0 = vcmp.eq.s32.totalorder %v3137_v59, %v3271_v26  ;;  %v1185_v30 = vunpack.c.l.bf16 %v1184_v28  ;;  %v1189_v57 = vrot.slane %v1184_v28, 6 }
  0x4c   : >> { %2101 = vmatpush1.bf16.msk.msra.mxu1 %vm2100_vm3, %v4758_v19  ;;  %vm2070_vm6 = vmpackc.low %vm427_vm15, %vm411_vm14  ;;  %vm461_vm14 = vcmp.eq.s32.totalorder %v3128_v56, %v3275_v27  ;;  %v3454_v5 = vrot.slane %v2969_v11, %v4773_v4  ;;  %v4774_v28 = vsub.s32 3, %v2933_v1 }
  0x4d   : >> { %2071 = vmatprep.subr.msk.bf16.mxu0 %vm2070_vm6, %v4758_v19  ;;  %vm2102_vm9 = vmpackc.low %vm429_vm2, %vm413_vm1  ;;  %vm458_vm1 = vcmp.eq.s32.totalorder %v3137_v59, %v3275_v27  ;;  %vm1192_vm2 = vcmask 1041408   ;;  %vm475_vm6 = vcmp.eq.s32.totalorder %v3123_v55, %v3294_v29  ;;  %v1186_v3 = vsub.f32 %v1183_v53, %v1185_v30 }
  0x4e   : >> { %2103 = vmatprep.subr.msk.bf16.mxu1 %vm2102_vm9, %v4758_v19  ;;  %vm2072_vm12 = vmpackc.low %vm426_vm5, %vm410_vm4  ;;  %vm444_vm4 = vcmp.eq.s32.totalorder %v3142_v60, %v3271_v26  ;;  %vm460_vm5 = vcmp.eq.s32.totalorder %v3142_v60, %v3275_v27  ;;  %vm477_vm9 = vcmp.eq.s32.totalorder %v3128_v56, %v3294_v29  ;;  %v3459_v2 = vrot.slane %v2969_v11, %v4774_v28 }
  0x4f   : >> { %2073 = vmatpush1.bf16.msk.msra.mxu0 %vm2072_vm12, %v4758_v19  ;;  %vm2104_vm15 = vmpackc.low %vm428_vm8, %vm412_vm7  ;;  %vm491_vm8 = vcmp.eq.s32.totalorder %v3123_v55, %v3304_v31  ;;  %vm474_vm12 = vcmp.eq.s32.totalorder %v3137_v59, %v3294_v29  ;;  %v1187_v4 = vpack.c.bf16 %v1186_v3, %v1186_v3  ;;  %v1195_v3 = vsel %vm1192_vm2, %v3306_v32, %v1189_v57 }
  0x50   : >> { %2105 = vmatpush1.bf16.msk.msra.mxu1 %vm2104_vm15, %v4758_v19  ;;  %vm2074_vm3 = vmpackc.low %vm459_vm11, %vm443_vm10  ;;  %vm493_vm10 = vcmp.eq.s32.totalorder %v3128_v56, %v3304_v31  ;;  %vm1196_vm15 = vcmask 1043456   ;;  %vm304_vm2 = vcmp.eq.s32.totalorder %v3442_v58, %v3150_v62  ;;  %v4804_v32 = vsub.s32 7, %v2933_v1 }
  0x51   : >> { %2075 = vmatprep.subr.msk.bf16.mxu0 %vm2074_vm3, %v4758_v19  ;;  %vm2106_vm7 = vmpackc.low %vm461_vm14, %vm445_vm13  ;;  %vm490_vm13 = vcmp.eq.s32.totalorder %v3137_v59, %v3304_v31  ;;  %vm476_vm14 = vcmp.eq.s32.totalorder %v3142_v60, %v3294_v29  ;;  %vm507_vm3 = vcmp.eq.s32.totalorder %v3123_v55, %v3318_v33  ;;  %v1191_v53 = vrot.slane %v1187_v4, 4 }
  0x52   : >> { %2107 = vmatprep.subr.msk.bf16.mxu1 %vm2106_vm7, %v4758_v19  ;;  %vm2076_vm11 = vmpackc.low %vm458_vm1, %vm442_vm0  ;;  %vm492_vm1 = vcmp.eq.s32.totalorder %v3142_v60, %v3304_v31  ;;  %vm523_vm7 = vcmp.eq.s32.totalorder %v3123_v55, %v3334_v54  ;;  %v3932_v57 = vrot.slane %v2969_v11, %v4804_v32  ;;  %v4805_v28 = vsub.s32 4, %v2933_v1 }
  0x53   : >> { %2077 = vmatpush1.bf16.msk.msra.mxu0 %vm2076_vm11, %v4758_v19  ;;  %vm2108_vm0 = vmpackc.low %vm460_vm5, %vm444_vm4  ;;  %vm509_vm4 = vcmp.eq.s32.totalorder %v3128_v56, %v3318_v33  ;;  %vm525_vm5 = vcmp.eq.s32.totalorder %v3128_v56, %v3334_v54  ;;  %v3538_v55 = vsel %vm1196_vm15, %v1195_v3, %v1191_v53  ;;  %v4781_v56 = vmov 0  }
  0x54   : >> { %2109 = vmatpush1.bf16.msk.msra.mxu1 %vm2108_vm0, %v4758_v19  ;;  %vm2078_vm11 = vmpackc.low %vm491_vm8, %vm475_vm6  ;;  %vm506_vm8 = vcmp.eq.s32.totalorder %v3137_v59, %v3318_v33  ;;  %vm522_vm0 = vcmp.eq.s32.totalorder %v3137_v59, %v3334_v54  ;;  %v4784_v59 = vsub.s32 2, %v2933_v1  ;;  %v3937_v4 = vrot.slane %v2969_v11, %v4805_v28 }
  0x55   : >> { %2079 = vmatprep.subr.msk.bf16.mxu0 %vm2078_vm11, %v4758_v19  ;;  %vm2110_vm6 = vmpackc.low %vm493_vm10, %vm477_vm9  ;;  %vm508_vm10 = vcmp.eq.s32.totalorder %v3142_v60, %v3318_v33  ;;  %vm524_vm11 = vcmp.eq.s32.totalorder %v3142_v60, %v3334_v54  ;;  %v4806_v3 = vsub.s32 6, %v2933_v1 }
  0x56   : >> { %2111 = vmatprep.subr.msk.bf16.mxu1 %vm2110_vm6, %v4758_v19  ;;  %vm2080_vm9 = vmpackc.low %vm490_vm13, %vm474_vm12  ;;  %vm321_vm6 = vcmp.eq.s32.totalorder %v3410_v51, %v3154_v63  ;;  %v3661_v60 = vrot.slane %v2969_v11, %v4784_v59 }
  0x57   : >> { %2081 = vmatpush1.bf16.msk.msra.mxu0 %vm2080_vm9, %v4758_v19  ;;  %vm2112_vm12 = vmpackc.low %vm492_vm1, %vm476_vm14  ;;  %v4775_v19 = vsub.s32 0, %v2933_v1  ;;  %vm287_vm14 = vcmp.eq.s32.totalorder %v3405_v52, %v3146_v61  ;;  %vm303_vm1 = vcmp.eq.s32.totalorder %v3405_v52, %v3150_v62  ;;  %vm305_vm9 = vcmp.eq.s32.totalorder %v3410_v51, %v3150_v62 }
  0x58   : >> { %2113 = vmatpush1.bf16.msk.msra.mxu1 %vm2112_vm12, %v4776_v7  ;;  %vm2082_vm13 = vmpackc.low %vm523_vm7, %vm507_vm3  ;;  %vm286_vm7 = vcmp.eq.s32.totalorder %v3426_v34, %v3146_v61  ;;  %vm302_vm12 = vcmp.eq.s32.totalorder %v3426_v34, %v3150_v62  ;;  %v3942_v53 = vrot.slane %v2969_v11, %v4806_v3 }
  0x59   : >> { %v3464_v6 = vrot.slane %v2969_v11, %v4775_v19  ;;  %2083 = vmatprep.subr.msk.bf16.mxu0 %vm2082_vm13, %v4776_v7  ;;  %vm2114_vm3 = vmpackc.low %vm525_vm5, %vm509_vm4  ;;  %vm288_vm4 = vcmp.eq.s32.totalorder %v3442_v58, %v3146_v61  ;;  %vm335_vm5 = vcmp.eq.s32.totalorder %v3405_v52, %v3158_v0  ;;  %v4803_v19 = vsub.s32 5, %v2933_v1 }
  0x5a   : >> { %2115 = vmatprep.subr.msk.bf16.mxu1 %vm2114_vm3, %v4776_v7  ;;  %vm2084_vm13 = vmpackc.low %vm522_vm0, %vm506_vm8  ;;  %vm353_vm0 = vcmp.eq.s32.totalorder %v3410_v51, %v3183_v20  ;;  %vm369_vm3 = vcmp.eq.s32.totalorder %v3410_v51, %v3187_v21 }
  0x5b   : >> { %2085 = vmatpush1.bf16.msk.msra.mxu0 %vm2084_vm13, %v4776_v7  ;;  %vm2116_vm8 = vmpackc.low %vm524_vm11, %vm508_vm10  ;;  %vm334_vm10 = vcmp.eq.s32.totalorder %v3426_v34, %v3158_v0  ;;  %vm320_vm11 = vcmp.eq.s32.totalorder %v3442_v58, %v3154_v63  ;;  %v3927_v30 = vrot.slane %v2969_v11, %v4803_v19 }
  0x5c   : >> { %2117 = vmatpush1.bf16.msk.msra.mxu1 %vm2116_vm8, %v4776_v7  ;;  %vm2118_vm13 = vmpackc.low %vm303_vm1, %vm287_vm14  ;;  %vm4777_vm14 = vcmp.eq.s32.totalorder %v3410_v51, %v3146_v61  ;;  %vm367_vm8 = vcmp.eq.s32.totalorder %v3405_v52, %v3187_v21 }
  0x5d   : >> { %2119 = vmatprep.subr.msk.bf16.mxu0 %vm2118_vm13, %v4776_v7  ;;  %vm2150_vm1 = vmpackc.low %vm305_vm9, %vm4777_vm14  ;;  %vm350_vm9 = vcmp.eq.s32.totalorder %v3426_v34, %v3183_v20  ;;  %vm529_vm14 = vcmp.eq.s32.totalorder %v3410_v51, %v3334_v54 }
  0x5e   : >> { %1233 = vmatmul.mubr.bf16.vlgmr.msra.gmra.mrb[0].mxu0 %v3538_v55  ;;  %2151 = vmatprep.subr.msk.bf16.mxu1 %vm2150_vm1, %v4776_v7  ;;  %vm2120_vm15 = vmpackc.low %vm302_vm12, %vm286_vm7  ;;  %vm368_vm12 = vcmp.eq.s32.totalorder %v3442_v58, %v3187_v21  ;;  %vm415_vm1 = vcmp.eq.s32.totalorder %v3405_v52, %v3240_v24 }
  0x5f   : >> { %1276 = vmatmul.mubr.bf16.vlgmr.msra.gmra.mrb[0].mxu1 %v3538_v55  ;;  %2121 = vmatpush1.bf16.msk.msra.mxu0 %vm2120_vm15, %v4776_v7  ;;  %vm2152_vm7 = vmpackc.low %vm304_vm2, %vm288_vm4  ;;  %vm4778_vm15 = vcmp.eq.s32.totalorder %v3405_v52, %v3154_v63  ;;  %vm385_vm4 = vcmp.eq.s32.totalorder %v3410_v51, %v3211_v22  ;;  %vm414_vm2 = vcmp.eq.s32.totalorder %v3426_v34, %v3240_v24 }
  0x60   : >> { %2153 = vmatpush1.bf16.msk.msra.mxu1 %vm2152_vm7, %v4776_v7  ;;  %vm2122_vm13 = vmpackc.low %vm335_vm5, %vm4778_vm15  ;;  %vm4779_vm5 = vcmp.eq.s32.totalorder %v3410_v51, %v3158_v0  ;;  %vm384_vm15 = vcmp.eq.s32.totalorder %v3442_v58, %v3211_v22  ;;  %1318 = vmatprep.mubr.bf16.mxu0 %v4781_v56 }
  0x61   : >> { %2123 = vmatprep.subr.msk.bf16.mxu0 %vm2122_vm13, %v4776_v7  ;;  %vm2154_vm7 = vmpackc.low %vm4779_vm5, %vm321_vm6  ;;  %vm4780_vm13 = vcmp.eq.s32.totalorder %v3426_v34, %v3154_v63  ;;  %1361 = vmatprep.mubr.bf16.mxu1 %v4781_v56  ;;  %vm416_vm5 = vcmp.eq.s32.totalorder %v3442_v58, %v3240_v24 }
  0x62   : >> { %2155 = vmatprep.subr.msk.bf16.mxu1 %vm2154_vm7, %v4776_v7  ;;  %vm2124_vm6 = vmpackc.low %vm334_vm10, %vm4780_vm13  ;;  %vm4782_vm10 = vcmp.eq.s32.totalorder %v3442_v58, %v3158_v0 }
  0x63   : >> { %2125 = vmatpush1.bf16.msk.msra.mxu0 %vm2124_vm6, %v4776_v7  ;;  %vm2156_vm13 = vmpackc.low %vm4782_vm10, %vm320_vm11  ;;  %vm4783_vm11 = vcmp.eq.s32.totalorder %v3405_v52, %v3183_v20  ;;  %vm447_vm6 = vcmp.eq.s32.totalorder %v3405_v52, %v3271_v26 }
  0x64   : >> { %2157 = vmatpush1.bf16.msk.msra.mxu1 %vm2156_vm13, %v4776_v7  ;;  %vm2126_vm10 = vmpackc.low %vm367_vm8, %vm4783_vm11  ;;  %vm449_vm13 = vcmp.eq.s32.totalorder %v3410_v51, %v3271_v26 }
  0x65   : >> { %2127 = vmatprep.subr.msk.bf16.mxu0 %vm2126_vm10, %v4776_v7  ;;  %vm2158_vm11 = vmpackc.low %vm369_vm3, %vm353_vm0  ;;  %vm4785_vm0 = vcmp.eq.s32.totalorder %v3426_v34, %v3187_v21  ;;  %vm526_vm10 = vcmp.eq.s32.totalorder %v3426_v34, %v3334_v54 }
  0x66   : >> { %2159 = vmatprep.subr.msk.bf16.mxu1 %vm2158_vm11, %v4776_v7  ;;  %vm2128_vm3 = vmpackc.low %vm4785_vm0, %vm350_vm9  ;;  %vm4786_vm9 = vcmp.eq.s32.totalorder %v3442_v58, %v3183_v20  ;;  %vm448_vm11 = vcmp.eq.s32.totalorder %v3442_v58, %v3271_v26 }
  0x67   : >> { %2129 = vmatpush1.bf16.msk.msra.mxu0 %vm2128_vm3, %v4776_v7  ;;  %vm2160_vm0 = vmpackc.low %vm368_vm12, %vm4786_vm9  ;;  %vm4787_vm12 = vcmp.eq.s32.totalorder %v3405_v52, %v3211_v22  ;;  %vm4788_vm9 = vcmp.eq.s32.totalorder %v3405_v52, %v3215_v23 }
  0x68   : >> { %2161 = vmatpush1.bf16.msk.msra.mxu1 %vm2160_vm0, %v4776_v7  ;;  %vm2130_vm7 = vmpackc.low %vm4788_vm9, %vm4787_vm12  ;;  %vm4789_vm12 = vcmp.eq.s32.totalorder %v3410_v51, %v3215_v23  ;;  %vm481_vm0 = vcmp.eq.s32.totalorder %v3410_v51, %v3294_v29 }
  0x69   : >> { %2131 = vmatprep.subr.msk.bf16.mxu0 %vm2130_vm7, %v4776_v7  ;;  %vm2162_vm9 = vmpackc.low %vm4789_vm12, %vm385_vm4  ;;  %vm4790_vm4 = vcmp.eq.s32.totalorder %v3426_v34, %v3211_v22  ;;  %vm4791_vm12 = vcmp.eq.s32.totalorder %v3426_v34, %v3215_v23  ;;  %vm478_vm7 = vcmp.eq.s32.totalorder %v3426_v34, %v3294_v29 }
  0x6a   : >> { %2163 = vmatprep.subr.msk.bf16.mxu1 %vm2162_vm9, %v4776_v7  ;;  %vm2132_vm8 = vmpackc.low %vm4791_vm12, %vm4790_vm4  ;;  %vm4792_vm4 = vcmp.eq.s32.totalorder %v3442_v58, %v3215_v23  ;;  %vm528_vm9 = vcmp.eq.s32.totalorder %v3442_v58, %v3334_v54 }
  0x6b   : >> { %2133 = vmatpush1.bf16.msk.msra.mxu0 %vm2132_vm8, %v4776_v7  ;;  %vm2164_vm12 = vmpackc.low %vm4792_vm4, %vm384_vm15  ;;  %vm4793_vm15 = vcmp.eq.s32.totalorder %v3405_v52, %v3244_v25  ;;  %vm511_vm8 = vcmp.eq.s32.totalorder %v3405_v52, %v3318_v33 }
  0x6c   : >> { %2165 = vmatpush1.bf16.msk.msra.mxu1 %vm2164_vm12, %v4776_v7  ;;  %vm2134_vm4 = vmpackc.low %vm4793_vm15, %vm415_vm1  ;;  %vm4794_vm1 = vcmp.eq.s32.totalorder %v3410_v51, %v3240_v24  ;;  %vm4795_vm15 = vcmp.eq.s32.totalorder %v3410_v51, %v3244_v25  ;;  %vm513_vm12 = vcmp.eq.s32.totalorder %v3410_v51, %v3318_v33 }
  0x6d   : >> { %2135 = vmatprep.subr.msk.bf16.mxu0 %vm2134_vm4, %v4776_v7  ;;  %vm2166_vm3 = vmpackc.low %vm4795_vm15, %vm4794_vm1  ;;  %vm4796_vm1 = vcmp.eq.s32.totalorder %v3426_v34, %v3244_v25  ;;  %vm4839_vm4 = vcmp.eq.s32.totalorder %v3454_v5, %v3215_v23 }
  0x6e   : >> { %2167 = vmatprep.subr.msk.bf16.mxu1 %vm2166_vm3, %v4776_v7  ;;  %vm2136_vm15 = vmpackc.low %vm4796_vm1, %vm414_vm2  ;;  %vm4797_vm2 = vcmp.eq.s32.totalorder %v3442_v58, %v3244_v25  ;;  %vm512_vm3 = vcmp.eq.s32.totalorder %v3442_v58, %v3318_v33 }
  0x6f   : >> { %2137 = vmatpush1.bf16.msk.msra.mxu0 %vm2136_vm15, %v4776_v7  ;;  %vm2168_vm1 = vmpackc.low %vm4797_vm2, %vm416_vm5  ;;  %vm4798_vm5 = vcmp.eq.s32.totalorder %v3405_v52, %v3275_v27  ;;  %vm4825_vm2 = vcmp.eq.s32.totalorder %v3459_v2, %v3158_v0 }
  0x70   : >> { %2169 = vmatpush1.bf16.msk.msra.mxu1 %vm2168_vm1, %v4776_v7  ;;  %vm2138_vm15 = vmpackc.low %vm4798_vm5, %vm447_vm6  ;;  %vm4799_vm6 = vcmp.eq.s32.totalorder %v3410_v51, %v3275_v27  ;;  %vm342_vm5 = vcmp.eq.s32.totalorder %v3937_v4, %v3158_v0 }
  0x71   : >> { %2139 = vmatprep.subr.msk.bf16.mxu0 %vm2138_vm15, %v4776_v7  ;;  %vm2170_vm1 = vmpackc.low %vm4799_vm6, %vm449_vm13  ;;  %vm4800_vm15 = vcmp.eq.s32.totalorder %v3426_v34, %v3271_v26  ;;  %vm4801_vm13 = vcmp.eq.s32.totalorder %v3426_v34, %v3275_v27 }
  0x72   : >> { %2171 = vmatprep.subr.msk.bf16.mxu1 %vm2170_vm1, %v4776_v7  ;;  %vm2140_vm6 = vmpackc.low %vm4801_vm13, %vm4800_vm15  ;;  %vm4802_vm1 = vcmp.eq.s32.totalorder %v3442_v58, %v3275_v27  ;;  %vm4808_vm13 = vcmp.eq.s32.totalorder %v3405_v52, %v3304_v31 }
  0x73   : >> { %2141 = vmatpush1.bf16.msk.msra.mxu0 %vm2140_vm6, %v4776_v7  ;;  %vm2172_vm15 = vmpackc.low %vm4802_vm1, %vm448_vm11  ;;  %vm4807_vm11 = vcmp.eq.s32.totalorder %v3405_v52, %v3294_v29  ;;  %vm510_vm1 = vcmp.eq.s32.totalorder %v3426_v34, %v3318_v33 }
  0x74   : >> { %2173 = vmatpush1.bf16.msk.msra.mxu1 %vm2172_vm15, %v4776_v7  ;;  %vm2142_vm6 = vmpackc.low %vm4808_vm13, %vm4807_vm11  ;;  %vm4809_vm15 = vcmp.eq.s32.totalorder %v3410_v51, %v3304_v31  ;;  %vm295_vm13 = vcmp.eq.s32.totalorder %v3927_v30, %v3146_v61 }
  0x75   : >> { %2143 = vmatprep.subr.msk.bf16.mxu0 %vm2142_vm6, %v4776_v7  ;;  %vm2174_vm11 = vmpackc.low %vm4809_vm15, %vm481_vm0  ;;  %vm4810_vm0 = vcmp.eq.s32.totalorder %v3426_v34, %v3304_v31  ;;  %vm327_vm15 = vcmp.eq.s32.totalorder %v3927_v30, %v3154_v63 }
  0x76   : >> { %2175 = vmatprep.subr.msk.bf16.mxu1 %vm2174_vm11, %v4776_v7  ;;  %vm2144_vm6 = vmpackc.low %vm4810_vm0, %vm478_vm7  ;;  %vm4811_vm11 = vcmp.eq.s32.totalorder %v3442_v58, %v3294_v29  ;;  %vm4812_vm7 = vcmp.eq.s32.totalorder %v3442_v58, %v3304_v31 }
  0x77   : >> { %2145 = vmatpush1.bf16.msk.msra.mxu0 %vm2144_vm6, %v4776_v7  ;;  %vm2176_vm0 = vmpackc.low %vm4812_vm7, %vm4811_vm11  ;;  %vm4813_vm6 = vcmp.eq.s32.totalorder %v3405_v52, %v3334_v54  ;;  %vm326_vm7 = vcmp.eq.s32.totalorder %v3937_v4, %v3154_v63 }
  0x78   : >> { %2177 = vmatpush1.bf16.msk.msra.mxu1 %vm2176_vm0, %v4776_v7  ;;  %vm2146_vm11 = vmpackc.low %vm4813_vm6, %vm511_vm8  ;;  %vm359_vm0 = vcmp.eq.s32.totalorder %v3927_v30, %v3183_v20  ;;  %vm375_vm6 = vcmp.eq.s32.totalorder %v3927_v30, %v3187_v21 }
  0x79   : >> { %2147 = vmatprep.subr.msk.bf16.mxu0 %vm2146_vm11, %v4776_v7  ;;  %vm2178_vm8 = vmpackc.low %vm529_vm14, %vm513_vm12  ;;  %vm358_vm12 = vcmp.eq.s32.totalorder %v3937_v4, %v3183_v20 }
  0x7a   : >> { %2179 = vmatprep.subr.msk.bf16.mxu1 %vm2178_vm8, %v4776_v7  ;;  %vm2148_vm14 = vmpackc.low %vm526_vm10, %vm510_vm1  ;;  %vm4821_vm1 = vcmp.eq.s32.totalorder %v3661_v60, %v3150_v62  ;;  %vm4823_vm8 = vcmp.eq.s32.totalorder %v3454_v5, %v3158_v0 }
  0x7b   : >> { %2149 = vmatpush1.bf16.msk.msra.mxu0 %vm2148_vm14, %v4776_v7  ;;  %vm2180_vm10 = vmpackc.low %vm528_vm9, %vm512_vm3  ;;  %vm4814_vm14 = vcmp.eq.s32.totalorder %v3454_v5, %v3146_v61  ;;  %vm4815_vm9 = vcmp.eq.s32.totalorder %v3454_v5, %v3150_v62 }
  0x7c   : >> { %2181 = vmatpush1.bf16.msk.msra.mxu1 %vm2180_vm10, %v4776_v7  ;;  %vm2182_vm3 = vmpackc.low %vm4815_vm9, %vm4814_vm14  ;;  %vm4816_vm10 = vcmp.eq.s32.totalorder %v3459_v2, %v3146_v61  ;;  %vm4817_vm14 = vcmp.eq.s32.totalorder %v3459_v2, %v3150_v62 }
  0x7d   : >> { %2183 = vmatprep.subr.msk.bf16.mxu0 %vm2182_vm3, %v4776_v7  ;;  %vm2214_vm9 = vmpackc.low %vm4817_vm14, %vm4816_vm10  ;;  %vm4818_vm3 = vcmp.eq.s32.totalorder %v3464_v6, %v3146_v61  ;;  %vm4819_vm10 = vcmp.eq.s32.totalorder %v3464_v6, %v3150_v62 }
  0x7e   : >> { %1319 = vmatmul.mubr.bf16.vlgmr.msra.gmra.mrb[4].mxu0 %v3538_v55  ;;  %2215 = vmatprep.subr.msk.bf16.mxu1 %vm2214_vm9, %v4776_v7  ;;  %vm2184_vm14 = vmpackc.low %vm4819_vm10, %vm4818_vm3  ;;  %vm4820_vm9 = vcmp.eq.s32.totalorder %v3661_v60, %v3146_v61 }
  0x7f   : >> { %1362 = vmatmul.mubr.bf16.vlgmr.msra.gmra.mrb[4].mxu1 %v3538_v55  ;;  %2185 = vmatpush1.bf16.msk.msra.mxu0 %vm2184_vm14, %v4776_v7  ;;  %vm2216_vm3 = vmpackc.low %vm4821_vm1, %vm4820_vm9  ;;  %vm4822_vm14 = vcmp.eq.s32.totalorder %v3454_v5, %v3154_v63  ;;  %vm4827_vm1 = vcmp.eq.s32.totalorder %v3464_v6, %v3158_v0  ;;  %vm4837_vm9 = vcmp.eq.s32.totalorder %v3661_v60, %v3187_v21 }
  0x80   : >> { %2217 = vmatpush1.bf16.msk.msra.mxu1 %vm2216_vm3, %v4776_v7  ;;  %vm2186_vm11 = vmpackc.low %vm4823_vm8, %vm4822_vm14  ;;  %1404 = vmatprep.mubr.bf16.mxu0 %v4781_v56  ;;  %vm4824_vm3 = vcmp.eq.s32.totalorder %v3459_v2, %v3154_v63  ;;  %vm4836_vm14 = vcmp.eq.s32.totalorder %v3661_v60, %v3183_v20 }
  0x81   : >> { %2187 = vmatprep.subr.msk.bf16.mxu0 %vm2186_vm11, %v4776_v7  ;;  %vm2218_vm8 = vmpackc.low %vm4825_vm2, %vm4824_vm3  ;;  %1447 = vmatprep.mubr.bf16.mxu1 %v4781_v56  ;;  %vm4826_vm11 = vcmp.eq.s32.totalorder %v3464_v6, %v3154_v63 }
  0x82   : >> { %2219 = vmatprep.subr.msk.bf16.mxu1 %vm2218_vm8, %v4776_v7  ;;  %vm2188_vm2 = vmpackc.low %vm4827_vm1, %vm4826_vm11  ;;  %vm4828_vm8 = vcmp.eq.s32.totalorder %v3661_v60, %v3154_v63  ;;  %vm4829_vm1 = vcmp.eq.s32.totalorder %v3661_v60, %v3158_v0 }
  0x83   : >> { %2189 = vmatpush1.bf16.msk.msra.mxu0 %vm2188_vm2, %v4776_v7  ;;  %vm2220_vm11 = vmpackc.low %vm4829_vm1, %vm4828_vm8  ;;  %vm4830_vm2 = vcmp.eq.s32.totalorder %v3454_v5, %v3183_v20  ;;  %vm4831_vm8 = vcmp.eq.s32.totalorder %v3454_v5, %v3187_v21 }
  0x84   : >> { %2221 = vmatpush1.bf16.msk.msra.mxu1 %vm2220_vm11, %v4776_v7  ;;  %vm2190_vm1 = vmpackc.low %vm4831_vm8, %vm4830_vm2  ;;  %vm4832_vm11 = vcmp.eq.s32.totalorder %v3459_v2, %v3183_v20  ;;  %vm4833_vm2 = vcmp.eq.s32.totalorder %v3459_v2, %v3187_v21 }
  0x85   : >> { %2191 = vmatprep.subr.msk.bf16.mxu0 %vm2190_vm1, %v4776_v7  ;;  %vm2222_vm8 = vmpackc.low %vm4833_vm2, %vm4832_vm11  ;;  %vm4834_vm1 = vcmp.eq.s32.totalorder %v3464_v6, %v3183_v20  ;;  %vm4835_vm11 = vcmp.eq.s32.totalorder %v3464_v6, %v3187_v21 }
  0x86   : >> { %2223 = vmatprep.subr.msk.bf16.mxu1 %vm2222_vm8, %v4776_v7  ;;  %vm2192_vm2 = vmpackc.low %vm4835_vm11, %vm4834_vm1  ;;  %vm4838_vm8 = vcmp.eq.s32.totalorder %v3454_v5, %v3211_v22  ;;  %vm4840_vm1 = vcmp.eq.s32.totalorder %v3459_v2, %v3211_v22  ;;  %vm4841_vm11 = vcmp.eq.s32.totalorder %v3459_v2, %v3215_v23 }
  0x87   : >> { %2193 = vmatpush1.bf16.msk.msra.mxu0 %vm2192_vm2, %v4776_v7  ;;  %vm2224_vm3 = vmpackc.low %vm4837_vm9, %vm4836_vm14  ;;  %vm4842_vm9 = vcmp.eq.s32.totalorder %v3464_v6, %v3211_v22  ;;  %vm4843_vm14 = vcmp.eq.s32.totalorder %v3464_v6, %v3215_v23 }
  0x88   : >> { %2225 = vmatpush1.bf16.msk.msra.mxu1 %vm2224_vm3, %v4776_v7  ;;  %vm2194_vm10 = vmpackc.low %vm4839_vm4, %vm4838_vm8  ;;  %vm4844_vm4 = vcmp.eq.s32.totalorder %v3661_v60, %v3211_v22 }
  0x89   : >> { %2195 = vmatprep.subr.msk.bf16.mxu0 %vm2194_vm10, %v4776_v7  ;;  %vm2226_vm2 = vmpackc.low %vm4841_vm11, %vm4840_vm1  ;;  %vm4845_vm10 = vcmp.eq.s32.totalorder %v3661_v60, %v3215_v23  ;;  %vm4846_vm1 = vcmp.eq.s32.totalorder %v3454_v5, %v3240_v24  ;;  %vm4847_vm11 = vcmp.eq.s32.totalorder %v3454_v5, %v3244_v25 }
  0x8a   : >> { %2227 = vmatprep.subr.msk.bf16.mxu1 %vm2226_vm2, %v4776_v7  ;;  %vm2196_vm3 = vmpackc.low %vm4843_vm14, %vm4842_vm9  ;;  %vm4848_vm9 = vcmp.eq.s32.totalorder %v3459_v2, %v3240_v24  ;;  %vm4849_vm14 = vcmp.eq.s32.totalorder %v3459_v2, %v3244_v25 }
  0x8b   : >> { %2197 = vmatpush1.bf16.msk.msra.mxu0 %vm2196_vm3, %v4776_v7  ;;  %vm2228_vm8 = vmpackc.low %vm4845_vm10, %vm4844_vm4  ;;  %vm4850_vm4 = vcmp.eq.s32.totalorder %v3464_v6, %v3240_v24  ;;  %vm4851_vm10 = vcmp.eq.s32.totalorder %v3464_v6, %v3244_v25 }
  0x8c   : >> { %2229 = vmatpush1.bf16.msk.msra.mxu1 %vm2228_vm8, %v4776_v7  ;;  %vm2198_vm2 = vmpackc.low %vm4847_vm11, %vm4846_vm1  ;;  %vm4852_vm1 = vcmp.eq.s32.totalorder %v3661_v60, %v3240_v24  ;;  %vm4853_vm11 = vcmp.eq.s32.totalorder %v3661_v60, %v3244_v25 }
  0x8d   : >> { %2199 = vmatprep.subr.msk.bf16.mxu0 %vm2198_vm2, %v4776_v7  ;;  %vm2230_vm3 = vmpackc.low %vm4849_vm14, %vm4848_vm9  ;;  %vm4854_vm9 = vcmp.eq.s32.totalorder %v3454_v5, %v3271_v26  ;;  %vm4855_vm14 = vcmp.eq.s32.totalorder %v3454_v5, %v3275_v27 }
  0x8e   : >> { %2231 = vmatprep.subr.msk.bf16.mxu1 %vm2230_vm3, %v4776_v7  ;;  %vm2200_vm8 = vmpackc.low %vm4851_vm10, %vm4850_vm4  ;;  %vm4856_vm4 = vcmp.eq.s32.totalorder %v3459_v2, %v3271_v26  ;;  %vm4857_vm10 = vcmp.eq.s32.totalorder %v3459_v2, %v3275_v27 }
  0x8f   : >> { %2201 = vmatpush1.bf16.msk.msra.mxu0 %vm2200_vm8, %v4776_v7  ;;  %vm2232_vm2 = vmpackc.low %vm4853_vm11, %vm4852_vm1  ;;  %vm4858_vm1 = vcmp.eq.s32.totalorder %v3464_v6, %v3271_v26  ;;  %vm4859_vm11 = vcmp.eq.s32.totalorder %v3464_v6, %v3275_v27 }
  0x90   : >> { %2233 = vmatpush1.bf16.msk.msra.mxu1 %vm2232_vm2, %v4776_v7  ;;  %vm2202_vm3 = vmpackc.low %vm4855_vm14, %vm4854_vm9  ;;  %vm4860_vm9 = vcmp.eq.s32.totalorder %v3661_v60, %v3271_v26  ;;  %vm4861_vm14 = vcmp.eq.s32.totalorder %v3661_v60, %v3275_v27 }
  0x91   : >> { %2203 = vmatprep.subr.msk.bf16.mxu0 %vm2202_vm3, %v4776_v7  ;;  %vm2234_vm8 = vmpackc.low %vm4857_vm10, %vm4856_vm4  ;;  %vm4862_vm4 = vcmp.eq.s32.totalorder %v3454_v5, %v3294_v29  ;;  %vm4863_vm10 = vcmp.eq.s32.totalorder %v3454_v5, %v3304_v31 }
  0x92   : >> { %2235 = vmatprep.subr.msk.bf16.mxu1 %vm2234_vm8, %v4776_v7  ;;  %vm2204_vm2 = vmpackc.low %vm4859_vm11, %vm4858_vm1  ;;  %vm4864_vm1 = vcmp.eq.s32.totalorder %v3459_v2, %v3294_v29  ;;  %vm4865_vm11 = vcmp.eq.s32.totalorder %v3459_v2, %v3304_v31 }
  0x93   : >> { %2205 = vmatpush1.bf16.msk.msra.mxu0 %vm2204_vm2, %v4776_v7  ;;  %vm2236_vm3 = vmpackc.low %vm4861_vm14, %vm4860_vm9  ;;  %vm4866_vm9 = vcmp.eq.s32.totalorder %v3464_v6, %v3294_v29  ;;  %vm4867_vm14 = vcmp.eq.s32.totalorder %v3464_v6, %v3304_v31 }
  0x94   : >> { %2237 = vmatpush1.bf16.msk.msra.mxu1 %vm2236_vm3, %v4776_v7  ;;  %vm2206_vm8 = vmpackc.low %vm4863_vm10, %vm4862_vm4  ;;  %vm4868_vm4 = vcmp.eq.s32.totalorder %v3661_v60, %v3294_v29  ;;  %vm4869_vm10 = vcmp.eq.s32.totalorder %v3661_v60, %v3304_v31 }
  0x95   : >> { %2207 = vmatprep.subr.msk.bf16.mxu0 %vm2206_vm8, %v4776_v7  ;;  %vm2238_vm2 = vmpackc.low %vm4865_vm11, %vm4864_vm1  ;;  %vm4870_vm1 = vcmp.eq.s32.totalorder %v3454_v5, %v3318_v33  ;;  %vm4871_vm11 = vcmp.eq.s32.totalorder %v3454_v5, %v3334_v54 }
  0x96   : >> { %2239 = vmatprep.subr.msk.bf16.mxu1 %vm2238_vm2, %v4776_v7  ;;  %vm2208_vm3 = vmpackc.low %vm4867_vm14, %vm4866_vm9  ;;  %vm4872_vm9 = vcmp.eq.s32.totalorder %v3459_v2, %v3318_v33  ;;  %vm4873_vm14 = vcmp.eq.s32.totalorder %v3459_v2, %v3334_v54 }
  0x97   : >> { %2209 = vmatpush1.bf16.msk.msra.mxu0 %vm2208_vm3, %v4776_v7  ;;  %vm2240_vm8 = vmpackc.low %vm4869_vm10, %vm4868_vm4  ;;  %vm4874_vm4 = vcmp.eq.s32.totalorder %v3464_v6, %v3318_v33  ;;  %vm4875_vm10 = vcmp.eq.s32.totalorder %v3464_v6, %v3334_v54 }
  0x98   : >> { %2241 = vmatpush1.bf16.msk.msra.mxu1 %vm2240_vm8, %v4776_v7  ;;  %vm2210_vm2 = vmpackc.low %vm4871_vm11, %vm4870_vm1  ;;  %vm4876_vm1 = vcmp.eq.s32.totalorder %v3661_v60, %v3318_v33  ;;  %vm4877_vm11 = vcmp.eq.s32.totalorder %v3661_v60, %v3334_v54 }
  0x99   : >> { %2211 = vmatprep.subr.msk.bf16.mxu0 %vm2210_vm2, %v4776_v7  ;;  %vm2242_vm3 = vmpackc.low %vm4873_vm14, %vm4872_vm9  ;;  %vm4878_vm9 = vcmp.eq.s32.totalorder %v3927_v30, %v3150_v62 }
  0x9a   : >> { %2243 = vmatprep.subr.msk.bf16.mxu1 %vm2242_vm3, %v4776_v7  ;;  %vm2212_vm8 = vmpackc.low %vm4875_vm10, %vm4874_vm4  ;;  %vm4879_vm3 = vcmp.eq.s32.totalorder %v3932_v57, %v3146_v61  ;;  %vm4880_vm4 = vcmp.eq.s32.totalorder %v3932_v57, %v3150_v62 }
  0x9b   : >> { %2213 = vmatpush1.bf16.msk.msra.mxu0 %vm2212_vm8, %v4776_v7  ;;  %vm2244_vm2 = vmpackc.low %vm4877_vm11, %vm4876_vm1  ;;  %vm4881_vm8 = vcmp.eq.s32.totalorder %v3937_v4, %v3146_v61  ;;  %vm4882_vm1 = vcmp.eq.s32.totalorder %v3937_v4, %v3150_v62  ;;  %vm4883_vm11 = vcmp.eq.s32.totalorder %v3942_v53, %v3146_v61 }
  0x9c   : >> { %2245 = vmatpush1.bf16.msk.msra.mxu1 %vm2244_vm2, %v4776_v7  ;;  %vm2246_vm14 = vmpackc.low %vm4878_vm9, %vm295_vm13  ;;  %vm4884_vm2 = vcmp.eq.s32.totalorder %v3942_v53, %v3150_v62 }
  0x9d   : >> { %2247 = vmatprep.subr.msk.bf16.mxu0 %vm2246_vm14, %v4776_v7  ;;  %vm2278_vm10 = vmpackc.low %vm4880_vm4, %vm4879_vm3  ;;  %vm4885_vm14 = vcmp.eq.s32.totalorder %v3927_v30, %v3158_v0  ;;  %vm4886_vm4 = vcmp.eq.s32.totalorder %v3932_v57, %v3154_v63 }
  0x9e   : >> { %1405 = vmatmul.mubr.bf16.vlgmr.msra.gmra.mrb[8].mxu0 %v3538_v55  ;;  %2279 = vmatprep.subr.msk.bf16.mxu1 %vm2278_vm10, %v4776_v7  ;;  %vm2248_vm13 = vmpackc.low %vm4882_vm1, %vm4881_vm8  ;;  %vm4887_vm10 = vcmp.eq.s32.totalorder %v3932_v57, %v3158_v0  ;;  %vm4888_vm1 = vcmp.eq.s32.totalorder %v3942_v53, %v3154_v63 }
  0x9f   : >> { %1448 = vmatmul.mubr.bf16.vlgmr.msra.gmra.mrb[8].mxu1 %v3538_v55  ;;  %2249 = vmatpush1.bf16.msk.msra.mxu0 %vm2248_vm13, %v4776_v7  ;;  %vm2280_vm9 = vmpackc.low %vm4884_vm2, %vm4883_vm11  ;;  %vm4889_vm13 = vcmp.eq.s32.totalorder %v3942_v53, %v3158_v0 }
  0xa0   : >> { %2281 = vmatpush1.bf16.msk.msra.mxu1 %vm2280_vm9, %v4776_v7  ;;  %vm2250_vm3 = vmpackc.low %vm4885_vm14, %vm327_vm15  ;;  %1490 = vmatprep.mubr.bf16.mxu0 %v4781_v56  ;;  %vm4892_vm14 = vcmp.eq.s32.totalorder %v3937_v4, %v3187_v21 }
  0xa1   : >> { %2251 = vmatprep.subr.msk.bf16.mxu0 %vm2250_vm3, %v4776_v7  ;;  %vm2282_vm8 = vmpackc.low %vm4887_vm10, %vm4886_vm4  ;;  %1533 = vmatprep.mubr.bf16.mxu1 %v4781_v56  ;;  %vm4895_vm10 = vcmp.eq.s32.totalorder %v3927_v30, %v3211_v22 }
  0xa2   : >> { %2283 = vmatprep.subr.msk.bf16.mxu1 %vm2282_vm8, %v4776_v7  ;;  %vm2252_vm15 = vmpackc.low %vm342_vm5, %vm326_vm7  ;;  %vm4890_vm5 = vcmp.eq.s32.totalorder %v3932_v57, %v3183_v20  ;;  %vm4891_vm7 = vcmp.eq.s32.totalorder %v3932_v57, %v3187_v21  ;;  %vm4896_vm8 = vcmp.eq.s32.totalorder %v3927_v30, %v3215_v23 }
  0xa3   : >> { %2253 = vmatpush1.bf16.msk.msra.mxu0 %vm2252_vm15, %v4776_v7  ;;  %vm2284_vm11 = vmpackc.low %vm4889_vm13, %vm4888_vm1  ;;  %vm4898_vm1 = vcmp.eq.s32.totalorder %v3932_v57, %v3215_v23 }
  0xa4   : >> { %2285 = vmatpush1.bf16.msk.msra.mxu1 %vm2284_vm11, %v4776_v7  ;;  %vm2254_vm2 = vmpackc.low %vm375_vm6, %vm359_vm0  ;;  %vm4893_vm0 = vcmp.eq.s32.totalorder %v3942_v53, %v3183_v20  ;;  %vm4894_vm6 = vcmp.eq.s32.totalorder %v3942_v53, %v3187_v21  ;;  %vm4899_vm11 = vcmp.eq.s32.totalorder %v3937_v4, %v3211_v22 }
  0xa5   : >> { %2255 = vmatprep.subr.msk.bf16.mxu0 %vm2254_vm2, %v4776_v7  ;;  %vm2286_vm9 = vmpackc.low %vm4891_vm7, %vm4890_vm5  ;;  %vm4900_vm2 = vcmp.eq.s32.totalorder %v3937_v4, %v3215_v23  ;;  %vm4901_vm7 = vcmp.eq.s32.totalorder %v3942_v53, %v3211_v22 }
  0xa6   : >> { %2287 = vmatprep.subr.msk.bf16.mxu1 %vm2286_vm9, %v4776_v7  ;;  %vm2256_vm3 = vmpackc.low %vm4892_vm14, %vm358_vm12  ;;  %vm4897_vm12 = vcmp.eq.s32.totalorder %v3932_v57, %v3211_v22  ;;  %vm4902_vm9 = vcmp.eq.s32.totalorder %v3942_v53, %v3215_v23 }
  0xa7   : >> { %2257 = vmatpush1.bf16.msk.msra.mxu0 %vm2256_vm3, %v4776_v7  ;;  %vm2288_vm4 = vmpackc.low %vm4894_vm6, %vm4893_vm0  ;;  %vm4903_vm3 = vcmp.eq.s32.totalorder %v3927_v30, %v3240_v24  ;;  %vm4904_vm0 = vcmp.eq.s32.totalorder %v3927_v30, %v3244_v25 }
  0xa8   : >> { %2289 = vmatpush1.bf16.msk.msra.mxu1 %vm2288_vm4, %v4776_v7  ;;  %vm2258_vm15 = vmpackc.low %vm4896_vm8, %vm4895_vm10  ;;  %vm4905_vm4 = vcmp.eq.s32.totalorder %v3932_v57, %v3240_v24  ;;  %vm4906_vm10 = vcmp.eq.s32.totalorder %v3932_v57, %v3244_v25 }
  0xa9   : >> { %2259 = vmatprep.subr.msk.bf16.mxu0 %vm2258_vm15, %v4776_v7  ;;  %vm2290_vm13 = vmpackc.low %vm4898_vm1, %vm4897_vm12  ;;  %vm4907_vm15 = vcmp.eq.s32.totalorder %v3937_v4, %v3240_v24  ;;  %vm4908_vm12 = vcmp.eq.s32.totalorder %v3937_v4, %v3244_v25 }
  0xaa   : >> { %2291 = vmatprep.subr.msk.bf16.mxu1 %vm2290_vm13, %v4776_v7  ;;  %vm2260_vm5 = vmpackc.low %vm4900_vm2, %vm4899_vm11  ;;  %vm4909_vm13 = vcmp.eq.s32.totalorder %v3942_v53, %v3240_v24  ;;  %vm4910_vm11 = vcmp.eq.s32.totalorder %v3942_v53, %v3244_v25 }
  0xab   : >> { %2261 = vmatpush1.bf16.msk.msra.mxu0 %vm2260_vm5, %v4776_v7  ;;  %vm2292_vm14 = vmpackc.low %vm4902_vm9, %vm4901_vm7  ;;  %vm4911_vm5 = vcmp.eq.s32.totalorder %v3927_v30, %v3271_v26  ;;  %vm4912_vm7 = vcmp.eq.s32.totalorder %v3927_v30, %v3275_v27 }
  0xac   : >> { %2293 = vmatpush1.bf16.msk.msra.mxu1 %vm2292_vm14, %v4776_v7  ;;  %vm2262_vm6 = vmpackc.low %vm4904_vm0, %vm4903_vm3  ;;  %vm4913_vm14 = vcmp.eq.s32.totalorder %v3932_v57, %v3271_v26  ;;  %vm4914_vm3 = vcmp.eq.s32.totalorder %v3932_v57, %v3275_v27 }
  0xad   : >> { %2263 = vmatprep.subr.msk.bf16.mxu0 %vm2262_vm6, %v4776_v7  ;;  %vm2294_vm8 = vmpackc.low %vm4906_vm10, %vm4905_vm4  ;;  %vm4915_vm6 = vcmp.eq.s32.totalorder %v3937_v4, %v3271_v26  ;;  %vm4916_vm4 = vcmp.eq.s32.totalorder %v3937_v4, %v3275_v27 }
  0xae   : >> { %2295 = vmatprep.subr.msk.bf16.mxu1 %vm2294_vm8, %v4776_v7  ;;  %vm2264_vm1 = vmpackc.low %vm4908_vm12, %vm4907_vm15  ;;  %vm4917_vm8 = vcmp.eq.s32.totalorder %v3942_v53, %v3271_v26  ;;  %vm4918_vm15 = vcmp.eq.s32.totalorder %v3942_v53, %v3275_v27 }
  0xaf   : >> { %2265 = vmatpush1.bf16.msk.msra.mxu0 %vm2264_vm1, %v4776_v7  ;;  %vm2296_vm2 = vmpackc.low %vm4910_vm11, %vm4909_vm13  ;;  %vm4919_vm1 = vcmp.eq.s32.totalorder %v3927_v30, %v3294_v29  ;;  %vm4920_vm13 = vcmp.eq.s32.totalorder %v3927_v30, %v3304_v31 }
  0xb0   : >> { %2297 = vmatpush1.bf16.msk.msra.mxu1 %vm2296_vm2, %v4776_v7  ;;  %vm2266_vm9 = vmpackc.low %vm4912_vm7, %vm4911_vm5  ;;  %vm4921_vm2 = vcmp.eq.s32.totalorder %v3932_v57, %v3294_v29  ;;  %vm4922_vm5 = vcmp.eq.s32.totalorder %v3932_v57, %v3304_v31 }
  0xb1   : >> { %2267 = vmatprep.subr.msk.bf16.mxu0 %vm2266_vm9, %v4776_v7  ;;  %vm2298_vm0 = vmpackc.low %vm4914_vm3, %vm4913_vm14  ;;  %vm4923_vm9 = vcmp.eq.s32.totalorder %v3937_v4, %v3294_v29  ;;  %vm4924_vm14 = vcmp.eq.s32.totalorder %v3937_v4, %v3304_v31 }
  0xb2   : >> { %2299 = vmatprep.subr.msk.bf16.mxu1 %vm2298_vm0, %v4776_v7  ;;  %vm2268_vm10 = vmpackc.low %vm4916_vm4, %vm4915_vm6  ;;  %vm4925_vm0 = vcmp.eq.s32.totalorder %v3942_v53, %v3294_v29  ;;  %vm4926_vm6 = vcmp.eq.s32.totalorder %v3942_v53, %v3304_v31 }
  0xb3   : >> { %2269 = vmatpush1.bf16.msk.msra.mxu0 %vm2268_vm10, %v4776_v7  ;;  %vm2300_vm12 = vmpackc.low %vm4918_vm15, %vm4917_vm8  ;;  %vm4927_vm10 = vcmp.eq.s32.totalorder %v3927_v30, %v3318_v33  ;;  %vm4928_vm8 = vcmp.eq.s32.totalorder %v3927_v30, %v3334_v54 }
  0xb4   : >> { %2301 = vmatpush1.bf16.msk.msra.mxu1 %vm2300_vm12, %v4776_v7  ;;  %vm2270_vm11 = vmpackc.low %vm4920_vm13, %vm4919_vm1  ;;  %vm4929_vm12 = vcmp.eq.s32.totalorder %v3932_v57, %v3318_v33  ;;  %vm4930_vm1 = vcmp.eq.s32.totalorder %v3932_v57, %v3334_v54 }
  0xb5   : >> { %2271 = vmatprep.subr.msk.bf16.mxu0 %vm2270_vm11, %v4776_v7  ;;  %vm2302_vm7 = vmpackc.low %vm4922_vm5, %vm4921_vm2  ;;  %vm4931_vm11 = vcmp.eq.s32.totalorder %v3937_v4, %v3318_v33  ;;  %vm4932_vm2 = vcmp.eq.s32.totalorder %v3937_v4, %v3334_v54 }
  0xb6   : >> { %2303 = vmatprep.subr.msk.bf16.mxu1 %vm2302_vm7, %v4776_v7  ;;  %vm2272_vm3 = vmpackc.low %vm4924_vm14, %vm4923_vm9  ;;  %vm4933_vm7 = vcmp.eq.s32.totalorder %v3942_v53, %v3318_v33  ;;  %vm4934_vm9 = vcmp.eq.s32.totalorder %v3942_v53, %v3334_v54 }
  0xb7   : >> { %2273 = vmatpush1.bf16.msk.msra.mxu0 %vm2272_vm3, %v4776_v7  ;;  %vm2304_vm4 = vmpackc.low %vm4926_vm6, %vm4925_vm0 }
  0xb8   : >> { %2305 = vmatpush1.bf16.msk.msra.mxu1 %vm2304_vm4, %v4776_v7  ;;  %vm2274_vm15 = vmpackc.low %vm4928_vm8, %vm4927_vm10 }
  0xb9   : >> { %2275 = vmatprep.subr.msk.bf16.mxu0 %vm2274_vm15, %v4776_v7  ;;  %vm2306_vm13 = vmpackc.low %vm4930_vm1, %vm4929_vm12 }
  0xba   : >> { %2307 = vmatprep.subr.msk.bf16.mxu1 %vm2306_vm13, %v4776_v7  ;;  %vm2276_vm5 = vmpackc.low %vm4932_vm2, %vm4931_vm11 }
  0xbb   : >> { %2277 = vmatpush1.bf16.msk.msra.mxu0 %vm2276_vm5, %v4776_v7  ;;  %vm2308_vm14 = vmpackc.low %vm4934_vm9, %vm4933_vm7 }
  0xbc   : >> { %2309 = vmatpush1.bf16.msk.msra.mxu1 %vm2308_vm14, %v4776_v7 }
  0xbe   : >> { %1491 = vmatmul.mubr.bf16.vlgmr.msra.gmra.mrb[12].mxu0 %v3538_v55 }
  0xbf   : >> { %1534 = vmatmul.mubr.bf16.vlgmr.msra.gmra.mrb[12].mxu1 %v3538_v55 }
 0x131   : >> { %v1234_v5 = vpop.f32.mrb[0].mxu0 }
 0x132   : >> { %v1560_v6 = vrot.slane %v1234_v5, 4  ;;  %v1277_v51 = vpop.f32.mrb[0].mxu1  ;;  %v1236_v52 = vpop.f32.mrb[1].mxu0 }
 0x133   : >> { %v1562_v61 = vrot.slane %v1277_v51, 4  ;;  %v1561_v62 = vrot.slane %v1236_v52, 4  ;;  %v1279_v63 = vpop.f32.mrb[1].mxu1  ;;  %v1238_v0 = vpop.f32.mrb[2].mxu0 }
 0x134   : >> { %v1592_v20 = vadd.f32 %v1560_v6, %v1234_v5  ;;  %v1563_v21 = vrot.slane %v1279_v63, 4  ;;  %v1281_v22 = vpop.f32.mrb[2].mxu1  ;;  %v1240_v23 = vpop.f32.mrb[3].mxu0 }
 0x135   : >> { %v1594_v54 = vadd.f32 %v1562_v61, %v1277_v51  ;;  %v1593_v24 = vadd.f32 %v1561_v62, %v1236_v52  ;;  %v1283_v25 = vpop.f32.mrb[3].mxu1 }
 0x136   : >> { %v1595_v7 = vadd.f32 %v1563_v21, %v1279_v63  ;;  %v1608_v26 = vadd.f32 %v1592_v20, %v1238_v0 }
 0x137   : >> { %v1610_v27 = vadd.f32 %v1594_v54, %v1281_v22  ;;  %v1609_v29 = vadd.f32 %v1593_v24, %v1240_v23 }
 0x138   : >> { %v4596_v50 = vadd.f32 %v2816_v50, %v1608_v26   ;;  %v1611_v31 = vadd.f32 %v1595_v7, %v1283_v25 }
 0x139   : >> { %v4599_v48 = vadd.f32 %v2808_v48, %v1610_v27   ;;  %v4602_v49 = vadd.f32 %v2812_v49, %v1609_v29  }
 0x13a   : >> { %v4935_v34 = vmov %v4596_v50  ;;  %v4605_v47 = vadd.f32 %v2804_v47, %v1611_v31  }
 0x13b   : >> { %v4936_v33 = vmov %v4599_v48  ;;  %v4937_v58 = vmov %v4602_v49 }
 0x13c   : >> { %v4938_v2 = vmov %v4605_v47 }
 0x151   : >> { %v1320_v55 = vpop.f32.mrb[4].mxu0 }
 0x152   : >> { %v1564_v56 = vrot.slane %v1320_v55, 4  ;;  %v1363_v59 = vpop.f32.mrb[4].mxu1  ;;  %v1322_v60 = vpop.f32.mrb[5].mxu0 }
 0x153   : >> { %v1566_v19 = vrot.slane %v1363_v59, 4  ;;  %v1565_v30 = vrot.slane %v1322_v60, 4  ;;  %v1365_v32 = vpop.f32.mrb[5].mxu1  ;;  %v1324_v57 = vpop.f32.mrb[6].mxu0 }
 0x154   : >> { %v1596_v28 = vadd.f32 %v1564_v56, %v1320_v55  ;;  %v1567_v50 = vrot.slane %v1365_v32, 4  ;;  %v1367_v4 = vpop.f32.mrb[6].mxu1  ;;  %v1326_v3 = vpop.f32.mrb[7].mxu0 }
 0x155   : >> { %v1598_v53 = vadd.f32 %v1566_v19, %v1363_v59  ;;  %v1597_v48 = vadd.f32 %v1565_v30, %v1322_v60  ;;  %v1369_v5 = vpop.f32.mrb[7].mxu1 }
 0x156   : >> { %v1599_v6 = vadd.f32 %v1567_v50, %v1365_v32  ;;  %v1612_v49 = vadd.f32 %v1596_v28, %v1324_v57 }
 0x157   : >> { %v1614_v51 = vadd.f32 %v1598_v53, %v1367_v4  ;;  %v1613_v52 = vadd.f32 %v1597_v48, %v1326_v3 }
 0x158   : >> { %v4608_v46 = vadd.f32 %v2800_v46, %v1612_v49   ;;  %v1615_v47 = vadd.f32 %v1599_v6, %v1369_v5 }
 0x159   : >> { %v4611_v44 = vadd.f32 %v2792_v44, %v1614_v51   ;;  %v4614_v45 = vadd.f32 %v2796_v45, %v1613_v52  }
 0x15a   : >> { %v4939_v61 = vmov %v4608_v46  ;;  %v4617_v43 = vadd.f32 %v2788_v43, %v1615_v47  }
 0x15b   : >> { %v4940_v62 = vmov %v4611_v44  ;;  %v4941_v63 = vmov %v4614_v45 }
 0x15c   : >> { %v4942_v0 = vmov %v4617_v43 }
 0x171   : >> { %v1406_v20 = vpop.f32.mrb[8].mxu0 }
 0x172   : >> { %v1568_v21 = vrot.slane %v1406_v20, 4  ;;  %v1449_v22 = vpop.f32.mrb[8].mxu1  ;;  %v1408_v23 = vpop.f32.mrb[9].mxu0 }
 0x173   : >> { %v1570_v54 = vrot.slane %v1449_v22, 4  ;;  %v1569_v24 = vrot.slane %v1408_v23, 4  ;;  %v1451_v25 = vpop.f32.mrb[9].mxu1  ;;  %v1410_v7 = vpop.f32.mrb[10].mxu0 }
 0x174   : >> { %v1600_v26 = vadd.f32 %v1568_v21, %v1406_v20  ;;  %v1571_v46 = vrot.slane %v1451_v25, 4  ;;  %v1453_v27 = vpop.f32.mrb[10].mxu1  ;;  %v1412_v29 = vpop.f32.mrb[11].mxu0 }
 0x175   : >> { %v1602_v31 = vadd.f32 %v1570_v54, %v1449_v22  ;;  %v1601_v44 = vadd.f32 %v1569_v24, %v1408_v23  ;;  %v1455_v55 = vpop.f32.mrb[11].mxu1 }
 0x176   : >> { %v1603_v56 = vadd.f32 %v1571_v46, %v1451_v25  ;;  %v1616_v45 = vadd.f32 %v1600_v26, %v1410_v7  ;;  %v4955_v46 = vmov %v4939_v61 }
 0x177   : >> { %v1618_v59 = vadd.f32 %v1602_v31, %v1453_v27  ;;  %v1617_v60 = vadd.f32 %v1601_v44, %v1412_v29  ;;  %v4953_v44 = vmov %v4940_v62  ;;  %v4968_v27 = vmov (%p4629_p1), %v4942_v0 }
 0x178   : >> { %v1632_v30 = vadd.f32 %v2784_v42, %v1616_v45   ;;  %v1619_v43 = vadd.f32 %v1603_v56, %v1455_v55  ;;  %v4954_v45 = vmov %v4941_v63  ;;  %v4970_v29 = vmov (%p4629_p1), %v4941_v63 }
 0x179   : >> { %v1634_v32 = vadd.f32 %v2776_v40, %v1618_v59   ;;  %v1633_v57 = vadd.f32 %v2780_v41, %v1617_v60   ;;  %v4972_v31 = vmov (%p4629_p1), %v4938_v2 }
 0x17a   : >> { %v1635_v28 = vadd.f32 %v2772_v39, %v1619_v43   ;;  %v4952_v43 = vmov %v4942_v0  ;;  %v4967_v26 = vmov (%p4629_p1), %v1632_v30 }
 0x191   : >> { %v1492_v19 = vpop.f32.mrb[12].mxu0 }
 0x192   : >> { %v1572_v50 = vrot.slane %v1492_v19, 4  ;;  %v1535_v4 = vpop.f32.mrb[12].mxu1  ;;  %v1494_v3 = vpop.f32.mrb[13].mxu0 }
 0x193   : >> { %v1574_v53 = vrot.slane %v1535_v4, 4  ;;  %v1573_v48 = vrot.slane %v1494_v3, 4  ;;  %v1537_v5 = vpop.f32.mrb[13].mxu1  ;;  %v1496_v6 = vpop.f32.mrb[14].mxu0 }
 0x194   : >> { %v1604_v49 = vadd.f32 %v1572_v50, %v1492_v19  ;;  %v1575_v51 = vrot.slane %v1537_v5, 4  ;;  %v1539_v52 = vpop.f32.mrb[14].mxu1  ;;  %v1498_v47 = vpop.f32.mrb[15].mxu0  ;;  %v4959_v50 = vmov %v4935_v34 }
 0x195   : >> { %v1606_v42 = vadd.f32 %v1574_v53, %v1535_v4  ;;  %v1605_v20 = vadd.f32 %v1573_v48, %v1494_v3  ;;  %v1541_v21 = vpop.f32.mrb[15].mxu1  ;;  %v4957_v48 = vmov %v4936_v33 }
 0x196   : >> { %v1607_v40 = vadd.f32 %v1575_v51, %v1537_v5  ;;  %v1620_v22 = vadd.f32 %v1604_v49, %v1496_v6  ;;  %v4958_v49 = vmov %v4937_v58  ;;  %183 = sbr.rel (!%p4629_p1) target bundleno = 54 (0x36), region = 66 }
 0x197   : >> { %v1622_v41 = vadd.f32 %v1606_v42, %v1539_v52  ;;  %v1621_v23 = vadd.f32 %v1605_v20, %v1498_v47  ;;  %v4951_v42 = vmov %v1632_v30  ;;  %v4956_v47 = vmov %v4938_v2 }
 0x198   : >> { %v1636_v54 = vadd.f32 %v2768_v38, %v1620_v22   ;;  %v1623_v39 = vadd.f32 %v1607_v40, %v1541_v21  ;;  %v4949_v40 = vmov %v1634_v32  ;;  %v4971_v30 = vmov (%p4629_p1), %v4939_v61 }
 0x199   : >> { %v1638_v24 = vadd.f32 %v2760_v36, %v1622_v41   ;;  %v1637_v25 = vadd.f32 %v2764_v37, %v1621_v23   ;;  %v4950_v41 = vmov %v1633_v57  ;;  %v4964_v23 = vmov (%p4629_p1), %v1635_v28 }
 0x19a   : >> { %v1639_v7 = vadd.f32 %v2756_v35, %v1623_v39   ;;  %v4947_v38 = vmov %v1636_v54  ;;  %v4948_v39 = vmov %v1635_v28  ;;  %v4963_v22 = vmov (%p4629_p1), %v1636_v54 }
 0x19b   : >> { %v4945_v36 = vmov %v1638_v24  ;;  %v4946_v37 = vmov %v1637_v25  ;;  %v4961_v20 = vmov (%p4629_p1), %v1638_v24  ;;  %v4962_v21 = vmov (%p4629_p1), %v1637_v25 }
 0x19c   : >> { %v4944_v35 = vmov %v1639_v7  ;;  %v4960_v19 = vmov (%p4629_p1), %v1639_v7  ;;  %v4965_v24 = vmov (%p4629_p1), %v1634_v32  ;;  %v4966_v25 = vmov (%p4629_p1), %v1633_v57 }
 0x19d   : > { %v4969_v28 = vmov %v4940_v62  ;;  %v4973_v32 = vmov %v4936_v33  ;;  %v4974_v33 = vmov %v4937_v58 }
 0x19e PF: > { %v1656_v1 = vcombine.low %v2884_v34, %v2880_v33  ;;  %v1657_v8 = vcombine.low %v2876_v32, %v2872_v31  ;;  %v1658_v9 = vcombine.low %v2868_v30, %v2864_v29  ;;  %v1659_v10 = vcombine.low %v2860_v28, %v2856_v27  ;;  %v2884_v34 = vphi %v3024_v34, %v4935_v34   ;;  %v2880_v33 = vphi %v3022_v33, %v4974_v33   ;;  %v2876_v32 = vphi %v3020_v32, %v4973_v32   ;;  %v2872_v31 = vphi %v3018_v31, %v4972_v31   ;;  %v2868_v30 = vphi %v3016_v30, %v4971_v30   ;;  %v2864_v29 = vphi %v3014_v29, %v4970_v29   ;;  %v2860_v28 = vphi %v3012_v28, %v4969_v28   ;;  %v2856_v27 = vphi %v3010_v27, %v4968_v27   ;;  %v2852_v26 = vphi %v3008_v26, %v4967_v26   ;;  %v2848_v25 = vphi %v3006_v25, %v4966_v25   ;;  %v2844_v24 = vphi %v3004_v24, %v4965_v24   ;;  %v2840_v23 = vphi %v3002_v23, %v4964_v23   ;;  %v2836_v22 = vphi %v3000_v22, %v4963_v22   ;;  %v2832_v21 = vphi %v2998_v21, %v4962_v21   ;;  %v2828_v20 = vphi %v2996_v20, %v4961_v20   ;;  %v2824_v19 = vphi %v2994_v19, %v4960_v19  }
 0x19f   : > { %v1660_v11 = vcombine.low %v2852_v26, %v2848_v25  ;;  %v1661_v12 = vcombine.low %v2844_v24, %v2840_v23  ;;  %v1662_v13 = vcombine.low %v2836_v22, %v2832_v21  ;;  %v1663_v14 = vcombine.low %v2828_v20, %v2824_v19 }
 0x1a0   : > { %1672 = vst [vmem:[%s2965_s8] sm:$0xff] %v1656_v1  ;;  %1673 = vst [vmem:[%s2965_s8 + $0x8] sm:$0xff] %v1657_v8 }
 0x1a1   : > { %1674 = vst [vmem:[%s2965_s8 + $0x10] sm:$0xff] %v1658_v9  ;;  %1675 = vst [vmem:[%s2965_s8 + $0x18] sm:$0xff] %v1659_v10 }
 0x1a2   : > { %1676 = vst [vmem:[%s2965_s8 + $0x20] sm:$0xff] %v1660_v11  ;;  %1677 = vst [vmem:[%s2965_s8 + $0x28] sm:$0xff] %v1661_v12 }
 0x1a3   : > { %1678 = vst [vmem:[%s2965_s8 + $0x30] sm:$0xff] %v1662_v13  ;;  %1679 = vst [vmem:[%s2965_s8 + $0x38] sm:$0xff] %v1663_v14 }
 0x1a4 PF: > { %s24_s1 = sadd.s32 1, %s2752_s1  }
 0x1a5   : > { %p21_p2 = scmp.ge.s32.totalorder %s24_s1, 4  }
 0x1a7   :  { %23 = sbr.rel (!%p21_p2) target bundleno = 26 (0x1a), region = 77 }

</bundles_post_ra>
